<compile_context>
chip_gen: v6e
topology: v6e:2x2x1
jax: 0.10.0
libtpu: 0.0.40
codegen_flags: <defaults>
</compile_context>

<pallas_src>
import jax
import jax.numpy as jnp
from jax import lax
from jax.experimental import pallas as pl
from jax.experimental.pallas import tpu as pltpu


# ---------------------------------------------------------------------------
# Fused kernel: QKV projection, logits, softmax, context, output projection,
#               bias and residual — one grid step per batch element.
# ---------------------------------------------------------------------------
def _fused_attn_kernel(q_ref, k_ref, v_ref, res_ref,
                       wq_ref, bq_ref, wk_ref, bk_ref, wv_ref, bv_ref,
                       wexp_ref, bfe_ref, attn_ref, out_ref):
    q_t = q_ref[0]                       # (C, N)  channel-major
    k_t = k_ref[0]                       # (C, N)
    v_t = v_ref[0]                       # (C, N)

    # 1x1-conv projections (contraction over C): trans_a dots -> (hidden, N)
    Q = lax.dot_general(wq_ref[...], q_t, (((0,), (0,)), ((), ())),
                        preferred_element_type=jnp.float32) + bq_ref[...]
    K = lax.dot_general(wk_ref[...], k_t, (((0,), (0,)), ((), ())),
                        preferred_element_type=jnp.float32) + bk_ref[...]
    V = lax.dot_general(wv_ref[...], v_t, (((0,), (0,)), ((), ())),
                        preferred_element_type=jnp.float32) + bv_ref[...]

    # logits: s[i, j] = sum_h Q[h, i] * K[h, j]
    s = lax.dot_general(Q, K, (((0,), (0,)), ((), ())),
                        preferred_element_type=jnp.float32)         # (N, N)

    # max-stabilized softmax; exact normalization (attn is API-visible)
    m = jnp.max(s, axis=-1, keepdims=True)
    e = jnp.exp(s - m)
    l = jnp.sum(e, axis=-1, keepdims=True)
    p = e / l
    attn_ref[0] = p

    # Output projection with the torch `.view` quirk pre-folded into Wexp:
    #   G[c*R + r, j] = sum_{h'} wf[h', c] * p[h'*R + r, j]
    G = lax.dot_general(wexp_ref[...], p, (((1,), (0,)), ((), ())),
                        preferred_element_type=jnp.float32)         # (C*R, N)
    #   Y[c*R + r, h] = sum_j G[c*R + r, j] * V[h, j]
    Y = lax.dot_general(G, V, (((1,), (1,)), ((), ())),
                        preferred_element_type=jnp.float32)         # (C*R, hid)

    # + bias + residual; row-major flatten of (C*R, hidden) == (C, N) per batch
    out_ref[0] = Y + bfe_ref[...] + res_ref[0]


# ---------------------------------------------------------------------------
# Fallback kernel 1 (tiled over query rows): QKV projection, logits, softmax,
# context z — used only when the fused path is not applicable.
# ---------------------------------------------------------------------------
def _attn_kernel(q_ref, k_ref, v_ref,
                 wq_ref, bq_ref, wk_ref, bk_ref, wv_ref, bv_ref,
                 attn_ref, z_ref):
    q_t = q_ref[0]                       # (C, tq)
    k_f = k_ref[0]                       # (C, N)  resident across query tiles
    v_f = v_ref[0]                       # (C, N)

    Q = lax.dot_general(wq_ref[...], q_t, (((0,), (0,)), ((), ())),
                        preferred_element_type=jnp.float32) + bq_ref[...]
    K = lax.dot_general(wk_ref[...], k_f, (((0,), (0,)), ((), ())),
                        preferred_element_type=jnp.float32) + bk_ref[...]
    V = lax.dot_general(wv_ref[...], v_f, (((0,), (0,)), ((), ())),
                        preferred_element_type=jnp.float32) + bv_ref[...]

    s = lax.dot_general(Q, K, (((0,), (0,)), ((), ())),
                        preferred_element_type=jnp.float32)         # (tq, N)
    m = jnp.max(s, axis=-1, keepdims=True)
    e = jnp.exp(s - m)
    l = jnp.sum(e, axis=-1, keepdims=True)
    p = e / l
    attn_ref[0] = p
    z_ref[0] = lax.dot_general(p, V, (((1,), (1,)), ((), ())),
                               preferred_element_type=jnp.float32)  # (tq, hid)


# ---------------------------------------------------------------------------
# Fallback kernel 2: output 1x1 conv (layer_f) on the raw-view z + bias +
# residual, producing the result in channel-major (B, C, N).
# ---------------------------------------------------------------------------
def _proj_kernel(zr_ref, h_ref, wf_ref, bf_ref, out_ref):
    out_ref[0] = (lax.dot_general(wf_ref[...], zr_ref[0],
                                  (((0,), (0,)), ((), ())),
                                  preferred_element_type=jnp.float32)
                  + bf_ref[...] + h_ref[0])


def _pick_tile(n, candidates):
    for c in candidates:
        if n % c == 0:
            return c
    return n  # full-extent fallback (always legal as a block dim)


# ---------------------------------------------------------------------------
# Wrapper
# ---------------------------------------------------------------------------
def self_attention_forward(q, k, v, params):
    B, C, H, W = q.shape
    N = H * W
    hidden = params["wq"].shape[1]

    # Free row-major reinterpretations: NCHW -> channel-major (B, C, N).
    q_cn = q.reshape(B, C, N)
    k_cn = k.reshape(B, C, N)
    v_cn = v.reshape(B, C, N)

    wq, wk, wv = params["wq"], params["wk"], params["wv"]
    bq = params["bq"].reshape(hidden, 1)
    bk = params["bk"].reshape(hidden, 1)
    bv = params["bv"].reshape(hidden, 1)

    vmem_budget = 24 * 1024 * 1024
    use_fused = (N % hidden == 0) and (6 * N * N * 4 <= vmem_budget)

    if use_fused:
        R = N // hidden
        # Wexp[c*R + r, h'*R + r'] = wf[h', c] * (r == r')   -> (C*R, N)
        wexp = jnp.einsum("hc,rs->crhs", params["wf"],
                          jnp.eye(R, dtype=params["wf"].dtype)).reshape(C * R, N)
        # bf expanded to the (C*R,) row layout of the fused output.
        bfe = jnp.repeat(params["bf"].reshape(C), R).reshape(C * R, 1)
        # Residual h = q, viewed as (B, C*R, hidden) — a free reshape.
        res_y = q.reshape(B, C * R, hidden)

        # TODO(synk): when B == 1 on v7x, split the batch/query axis so both
        #             TensorCores get a grid point (single grid point here).
        attn, out_y = pl.pallas_call(
            _fused_attn_kernel,
            out_shape=(jax.ShapeDtypeStruct((B, N, N), jnp.float32),
                       jax.ShapeDtypeStruct((B, C * R, hidden), jnp.float32)),
            grid_spec=pltpu.PrefetchScalarGridSpec(
                num_scalar_prefetch=0,
                grid=(B,),
                in_specs=[
                    pl.BlockSpec((1, C, N), lambda b: (b, 0, 0)),          # q
                    pl.BlockSpec((1, C, N), lambda b: (b, 0, 0)),          # k
                    pl.BlockSpec((1, C, N), lambda b: (b, 0, 0)),          # v
                    pl.BlockSpec((1, C * R, hidden), lambda b: (b, 0, 0)), # residual
                    pl.BlockSpec((C, hidden), lambda b: (0, 0)),           # wq
                    pl.BlockSpec((hidden, 1), lambda b: (0, 0)),           # bq
                    pl.BlockSpec((C, hidden), lambda b: (0, 0)),           # wk
                    pl.BlockSpec((hidden, 1), lambda b: (0, 0)),           # bk
                    pl.BlockSpec((C, hidden), lambda b: (0, 0)),           # wv
                    pl.BlockSpec((hidden, 1), lambda b: (0, 0)),           # bv
                    pl.BlockSpec((C * R, N), lambda b: (0, 0)),            # Wexp
                    pl.BlockSpec((C * R, 1), lambda b: (0, 0)),            # bf expanded
                ],
                out_specs=[
                    pl.BlockSpec((1, N, N), lambda b: (b, 0, 0)),          # attn
                    pl.BlockSpec((1, C * R, hidden), lambda b: (b, 0, 0)), # out
                ],
            ),
            compiler_params=pltpu.CompilerParams(
                dimension_semantics=("parallel",),
                vmem_limit_bytes=32 * 1024 * 1024,
            ),
        )(q_cn, k_cn, v_cn, res_y, wq, bq, wk, bk, wv, bv, wexp, bfe)

        # (B, C*R, hidden) row-major == (B, C, N) == (B, C, H, W): free reshape.
        out = out_y.reshape(B, C, H, W)
        return out, attn

    # ----------------------- tiled two-kernel fallback -----------------------
    tq = _pick_tile(N, (512, 256, 128))
    if B * (N // tq) < 2 and N % 128 == 0 and N > 128:
        tq = 128   # give v7x's second TensorCore work on tiny batches
    nq = N // tq

    cparams = pltpu.CompilerParams(
        dimension_semantics=("parallel", "parallel"),
        vmem_limit_bytes=32 * 1024 * 1024,
    )

    attn, z = pl.pallas_call(
        _attn_kernel,
        out_shape=(jax.ShapeDtypeStruct((B, N, N), jnp.float32),
                   jax.ShapeDtypeStruct((B, N, hidden), jnp.float32)),
        grid_spec=pltpu.PrefetchScalarGridSpec(
            num_scalar_prefetch=0,
            grid=(B, nq),
            in_specs=[
                pl.BlockSpec((1, C, tq), lambda b, i: (b, 0, i)),   # q tile
                pl.BlockSpec((1, C, N), lambda b, i: (b, 0, 0)),    # k (resident)
                pl.BlockSpec((1, C, N), lambda b, i: (b, 0, 0)),    # v (resident)
                pl.BlockSpec((C, hidden), lambda b, i: (0, 0)),
                pl.BlockSpec((hidden, 1), lambda b, i: (0, 0)),
                pl.BlockSpec((C, hidden), lambda b, i: (0, 0)),
                pl.BlockSpec((hidden, 1), lambda b, i: (0, 0)),
                pl.BlockSpec((C, hidden), lambda b, i: (0, 0)),
                pl.BlockSpec((hidden, 1), lambda b, i: (0, 0)),
            ],
            out_specs=[
                pl.BlockSpec((1, tq, N), lambda b, i: (b, i, 0)),        # attn
                pl.BlockSpec((1, tq, hidden), lambda b, i: (b, i, 0)),   # z
            ],
        ),
        compiler_params=cparams,
    )(q_cn, k_cn, v_cn, wq, bq, wk, bk, wv, bv)

    # torch `.view(B, hidden, H, W)` quirk: raw row-major reinterpretation of
    # the contiguous (B, N, hidden) buffer — a free reshape, NO transpose.
    zr = z.reshape(B, hidden, N)
    bf_col = params["bf"].reshape(C, 1)

    tn = _pick_tile(N, (2048, 1024, 512, 256, 128))
    nt = N // tn

    out_cn = pl.pallas_call(
        _proj_kernel,
        out_shape=jax.ShapeDtypeStruct((B, C, N), jnp.float32),
        grid_spec=pltpu.PrefetchScalarGridSpec(
            num_scalar_prefetch=0,
            grid=(B, nt),
            in_specs=[
                pl.BlockSpec((1, hidden, tn), lambda b, i: (b, 0, i)),   # raw-view z
                pl.BlockSpec((1, C, tn), lambda b, i: (b, 0, i)),        # residual
                pl.BlockSpec((hidden, C), lambda b, i: (0, 0)),
                pl.BlockSpec((C, 1), lambda b, i: (0, 0)),
            ],
            out_specs=pl.BlockSpec((1, C, tn), lambda b, i: (b, 0, i)),
        ),
        compiler_params=pltpu.CompilerParams(
            dimension_semantics=("parallel", "parallel"),
            vmem_limit_bytes=32 * 1024 * 1024,
        ),
    )(zr, q_cn, params["wf"], bf_col)

    out = out_cn.reshape(B, C, H, W)
    return out, attn


# ---------------------------------------------------------------------------
# Pure-JAX reference (mirrors the torch forward exactly, all f32)
# ---------------------------------------------------------------------------
def self_attention_ref(q, k, v, params):
    B, C, H, W = q.shape
    N = H * W
    hidden = params["wq"].shape[1]
    h = q
    qn = q.reshape(B, C, N).transpose(0, 2, 1)
    kn = k.reshape(B, C, N).transpose(0, 2, 1)
    vn = v.reshape(B, C, N).transpose(0, 2, 1)
    Q = qn @ params["wq"] + params["bq"]              # (B, N, hidden)
    K = kn @ params["wk"] + params["bk"]
    V = vn @ params["wv"] + params["bv"]
    attn = Q @ K.transpose(0, 2, 1)                   # (B, N, N)
    attn = jax.nn.softmax(attn, axis=-1)
    z = attn @ V                                      # (B, N, hidden)
    zr = z.reshape(B, hidden, N)                      # torch .view quirk
    zt = zr.transpose(0, 2, 1)
    out = zt @ params["wf"] + params["bf"] + h.reshape(B, C, N).transpose(0, 2, 1)
    return out.transpose(0, 2, 1).reshape(B, C, H, W), attn


if __name__ == "__main__":
    B, C, H, W = 2, 4, 16, 16
    hidden = 32

    key = jax.random.PRNGKey(0)
    keys = jax.random.split(key, 11)

    q = jax.random.normal(keys[0], (B, C, H, W), jnp.float32)
    k = jax.random.normal(keys[1], (B, C, H, W), jnp.float32)
    v = jax.random.normal(keys[2], (B, C, H, W), jnp.float32)

    # Conv2d(in, out, 1) weight (out, in, 1, 1) is stored transposed as (in, out)
    # so the kernels compute x @ W + b in channel-major form.
    s_in = 1.0 / jnp.sqrt(jnp.float32(C))
    s_hd = 1.0 / jnp.sqrt(jnp.float32(hidden))
    params = {
        "wq": jax.random.normal(keys[3], (C, hidden), jnp.float32) * s_in,
        "bq": jax.random.normal(keys[4], (1, hidden), jnp.float32) * 0.1,
        "wk": jax.random.normal(keys[5], (C, hidden), jnp.float32) * s_in,
        "bk": jax.random.normal(keys[6], (1, hidden), jnp.float32) * 0.1,
        "wv": jax.random.normal(keys[7], (C, hidden), jnp.float32) * s_in,
        "bv": jax.random.normal(keys[8], (1, hidden), jnp.float32) * 0.1,
        "wf": jax.random.normal(keys[9], (hidden, C), jnp.float32) * s_hd,
        "bf": jax.random.normal(keys[10], (1, C), jnp.float32) * 0.1,
    }

    out, attn = self_attention_forward(q, k, v, params)
    jax.block_until_ready((out, attn))

    assert out.shape == (B, C, H, W)
    assert attn.shape == (B, H * W, H * W)

    out_ref, attn_ref = self_attention_ref(q, k, v, params)
    assert jnp.allclose(attn, attn_ref, rtol=1e-2, atol=1e-2)
    assert jnp.allclose(out, out_ref, rtol=1e-2, atol=1e-2)

    print("KERNEL_OK")
</pallas_src>

<mosaic_0001>
module attributes {stable_mosaic.version = 11 : i64} {
  func.func @_fused_attn_kernel(%arg0: i32, %arg1: memref<1x4x256xf32, #tpu.memory_space<vmem>>, %arg2: memref<1x4x256xf32, #tpu.memory_space<vmem>>, %arg3: memref<1x4x256xf32, #tpu.memory_space<vmem>>, %arg4: memref<1x32x32xf32, #tpu.memory_space<vmem>>, %arg5: memref<4x32xf32, #tpu.memory_space<vmem>>, %arg6: memref<32x1xf32, #tpu.memory_space<vmem>>, %arg7: memref<4x32xf32, #tpu.memory_space<vmem>>, %arg8: memref<32x1xf32, #tpu.memory_space<vmem>>, %arg9: memref<4x32xf32, #tpu.memory_space<vmem>>, %arg10: memref<32x1xf32, #tpu.memory_space<vmem>>, %arg11: memref<32x256xf32, #tpu.memory_space<vmem>>, %arg12: memref<32x1xf32, #tpu.memory_space<vmem>>, %arg13: memref<1x256x256xf32, #tpu.memory_space<vmem>>, %arg14: memref<1x32x32xf32, #tpu.memory_space<vmem>>) attributes {dimension_semantics = [#tpu.dimension_semantics<parallel>], iteration_bounds = array<i64: 2>, scalar_prefetch = 0 : i64, scratch_operands = 0 : i64, tpu.core_type = #tpu.core_type<tc>, window_params = [{transform_indices = @transform_0, window_bounds = array<i64: 1, 4, 256>}, {transform_indices = @transform_1, window_bounds = array<i64: 1, 4, 256>}, {transform_indices = @transform_2, window_bounds = array<i64: 1, 4, 256>}, {transform_indices = @transform_3, window_bounds = array<i64: 1, 32, 32>}, {pipeline_mode = #tpu.pipeline_mode<synchronous>, transform_indices = @transform_4, window_bounds = array<i64: 4, 32>}, {pipeline_mode = #tpu.pipeline_mode<synchronous>, transform_indices = @transform_5, window_bounds = array<i64: 32, 1>}, {pipeline_mode = #tpu.pipeline_mode<synchronous>, transform_indices = @transform_6, window_bounds = array<i64: 4, 32>}, {pipeline_mode = #tpu.pipeline_mode<synchronous>, transform_indices = @transform_7, window_bounds = array<i64: 32, 1>}, {pipeline_mode = #tpu.pipeline_mode<synchronous>, transform_indices = @transform_8, window_bounds = array<i64: 4, 32>}, {pipeline_mode = #tpu.pipeline_mode<synchronous>, transform_indices = @transform_9, window_bounds = array<i64: 32, 1>}, {pipeline_mode = #tpu.pipeline_mode<synchronous>, transform_indices = @transform_10, window_bounds = array<i64: 32, 256>}, {pipeline_mode = #tpu.pipeline_mode<synchronous>, transform_indices = @transform_11, window_bounds = array<i64: 32, 1>}, {transform_indices = @transform_12, window_bounds = array<i64: 1, 256, 256>}, {transform_indices = @transform_13, window_bounds = array<i64: 1, 32, 32>}]} {
    %c0 = arith.constant 0 : index
    %c0_0 = arith.constant 0 : index
    %c0_1 = arith.constant 0 : index
    %0 = vector.load %arg1[%c0, %c0_0, %c0_1] : memref<1x4x256xf32, #tpu.memory_space<vmem>>, vector<1x4x256xf32>
    %1 = vector.shape_cast %0 : vector<1x4x256xf32> to vector<4x256xf32>
    %c0_2 = arith.constant 0 : index
    %c0_3 = arith.constant 0 : index
    %c0_4 = arith.constant 0 : index
    %2 = vector.load %arg2[%c0_2, %c0_3, %c0_4] : memref<1x4x256xf32, #tpu.memory_space<vmem>>, vector<1x4x256xf32>
    %3 = vector.shape_cast %2 : vector<1x4x256xf32> to vector<4x256xf32>
    %c0_5 = arith.constant 0 : index
    %c0_6 = arith.constant 0 : index
    %c0_7 = arith.constant 0 : index
    %4 = vector.load %arg3[%c0_5, %c0_6, %c0_7] : memref<1x4x256xf32, #tpu.memory_space<vmem>>, vector<1x4x256xf32>
    %5 = vector.shape_cast %4 : vector<1x4x256xf32> to vector<4x256xf32>
    %c0_8 = arith.constant 0 : index
    %c0_9 = arith.constant 0 : index
    %6 = vector.load %arg5[%c0_8, %c0_9] : memref<4x32xf32, #tpu.memory_space<vmem>>, vector<4x32xf32>
    %cst = arith.constant dense<0.000000e+00> : vector<32x256xf32>
    %7 = tpu.matmul %6, %1, %cst {dimension_numbers = #tpu.dot_dimension_numbers<[0], [0], [1], [1], [0, 1, 1, 1], [], []>} : vector<4x32xf32>, vector<4x256xf32>, vector<32x256xf32> -> vector<32x256xf32>
    %c0_10 = arith.constant 0 : index
    %c0_11 = arith.constant 0 : index
    %8 = vector.load %arg6[%c0_10, %c0_11] : memref<32x1xf32, #tpu.memory_space<vmem>>, vector<32x1xf32>
    %9 = vector.broadcast %8 : vector<32x1xf32> to vector<32x256xf32>
    %10 = arith.addf %7, %9 : vector<32x256xf32>
    %c0_12 = arith.constant 0 : index
    %c0_13 = arith.constant 0 : index
    %11 = vector.load %arg7[%c0_12, %c0_13] : memref<4x32xf32, #tpu.memory_space<vmem>>, vector<4x32xf32>
    %cst_14 = arith.constant dense<0.000000e+00> : vector<32x256xf32>
    %12 = tpu.matmul %11, %3, %cst_14 {dimension_numbers = #tpu.dot_dimension_numbers<[0], [0], [1], [1], [0, 1, 1, 1], [], []>} : vector<4x32xf32>, vector<4x256xf32>, vector<32x256xf32> -> vector<32x256xf32>
    %c0_15 = arith.constant 0 : index
    %c0_16 = arith.constant 0 : index
    %13 = vector.load %arg8[%c0_15, %c0_16] : memref<32x1xf32, #tpu.memory_space<vmem>>, vector<32x1xf32>
    %14 = vector.broadcast %13 : vector<32x1xf32> to vector<32x256xf32>
    %15 = arith.addf %12, %14 : vector<32x256xf32>
    %c0_17 = arith.constant 0 : index
    %c0_18 = arith.constant 0 : index
    %16 = vector.load %arg9[%c0_17, %c0_18] : memref<4x32xf32, #tpu.memory_space<vmem>>, vector<4x32xf32>
    %cst_19 = arith.constant dense<0.000000e+00> : vector<32x256xf32>
    %17 = tpu.matmul %16, %5, %cst_19 {dimension_numbers = #tpu.dot_dimension_numbers<[0], [0], [1], [1], [0, 1, 1, 1], [], []>} : vector<4x32xf32>, vector<4x256xf32>, vector<32x256xf32> -> vector<32x256xf32>
    %c0_20 = arith.constant 0 : index
    %c0_21 = arith.constant 0 : index
    %18 = vector.load %arg10[%c0_20, %c0_21] : memref<32x1xf32, #tpu.memory_space<vmem>>, vector<32x1xf32>
    %19 = vector.broadcast %18 : vector<32x1xf32> to vector<32x256xf32>
    %20 = arith.addf %17, %19 : vector<32x256xf32>
    %cst_22 = arith.constant dense<0.000000e+00> : vector<256x256xf32>
    %21 = tpu.matmul %10, %15, %cst_22 {dimension_numbers = #tpu.dot_dimension_numbers<[0], [0], [1], [1], [0, 1, 1, 1], [], []>} : vector<32x256xf32>, vector<32x256xf32>, vector<256x256xf32> -> vector<256x256xf32>
    %cst_23 = arith.constant dense<0xFF800000> : vector<256xf32>
    %22 = vector.multi_reduction <maximumf>, %21, %cst_23 [1] : vector<256x256xf32> to vector<256xf32>
    %23 = vector.shape_cast %22 : vector<256xf32> to vector<256x1xf32>
    %24 = vector.broadcast %23 : vector<256x1xf32> to vector<256x256xf32>
    %25 = arith.subf %21, %24 : vector<256x256xf32>
    %26 = math.exp %25 : vector<256x256xf32>
    %cst_24 = arith.constant dense<0.000000e+00> : vector<256xf32>
    %27 = vector.multi_reduction <add>, %26, %cst_24 [1] : vector<256x256xf32> to vector<256xf32>
    %28 = vector.shape_cast %27 : vector<256xf32> to vector<256x1xf32>
    %29 = vector.broadcast %28 : vector<256x1xf32> to vector<256x256xf32>
    %30 = arith.divf %26, %29 : vector<256x256xf32>
    %c0_25 = arith.constant 0 : index
    %c0_26 = arith.constant 0 : index
    %c0_27 = arith.constant 0 : index
    %31 = vector.load %arg13[%c0_25, %c0_26, %c0_27] : memref<1x256x256xf32, #tpu.memory_space<vmem>>, vector<1x256x256xf32>
    %32 = vector.shape_cast %31 : vector<1x256x256xf32> to vector<256x256xf32>
    %33 = vector.shape_cast %30 : vector<256x256xf32> to vector<1x256x256xf32>
    tpu.vector_store %arg13[%c0_25, %c0_26, %c0_27], %33 {strides = array<i32>} : memref<1x256x256xf32, #tpu.memory_space<vmem>>, vector<1x256x256xf32>,
    %c0_28 = arith.constant 0 : index
    %c0_29 = arith.constant 0 : index
    %34 = vector.load %arg11[%c0_28, %c0_29] : memref<32x256xf32, #tpu.memory_space<vmem>>, vector<32x256xf32>
    %cst_30 = arith.constant dense<0.000000e+00> : vector<32x256xf32>
    %35 = tpu.matmul %34, %30, %cst_30 {dimension_numbers = #tpu.dot_dimension_numbers<[1], [0], [0], [1], [0, 0, 1, 1], [], []>} : vector<32x256xf32>, vector<256x256xf32>, vector<32x256xf32> -> vector<32x256xf32>
    %cst_31 = arith.constant dense<0.000000e+00> : vector<32x32xf32>
    %36 = tpu.matmul %35, %20, %cst_31 {dimension_numbers = #tpu.dot_dimension_numbers<[1], [1], [0], [0], [0, 0, 1, 0], [], []>} : vector<32x256xf32>, vector<32x256xf32>, vector<32x32xf32> -> vector<32x32xf32>
    %c0_32 = arith.constant 0 : index
    %c0_33 = arith.constant 0 : index
    %37 = vector.load %arg12[%c0_32, %c0_33] : memref<32x1xf32, #tpu.memory_space<vmem>>, vector<32x1xf32>
    %38 = vector.broadcast %37 : vector<32x1xf32> to vector<32x32xf32>
    %39 = arith.addf %36, %38 : vector<32x32xf32>
    %c0_34 = arith.constant 0 : index
    %c0_35 = arith.constant 0 : index
    %c0_36 = arith.constant 0 : index
    %40 = vector.load %arg4[%c0_34, %c0_35, %c0_36] : memref<1x32x32xf32, #tpu.memory_space<vmem>>, vector<1x32x32xf32>
    %41 = vector.shape_cast %40 : vector<1x32x32xf32> to vector<32x32xf32>
    %42 = arith.addf %39, %41 : vector<32x32xf32>
    %c0_37 = arith.constant 0 : index
    %c0_38 = arith.constant 0 : index
    %c0_39 = arith.constant 0 : index
    %43 = vector.load %arg14[%c0_37, %c0_38, %c0_39] : memref<1x32x32xf32, #tpu.memory_space<vmem>>, vector<1x32x32xf32>
    %44 = vector.shape_cast %43 : vector<1x32x32xf32> to vector<32x32xf32>
    %45 = vector.shape_cast %42 : vector<32x32xf32> to vector<1x32x32xf32>
    tpu.vector_store %arg14[%c0_37, %c0_38, %c0_39], %45 {strides = array<i32>} : memref<1x32x32xf32, #tpu.memory_space<vmem>>, vector<1x32x32xf32>,
    return
  }
  func.func @transform_0(%arg0: i32) -> (i32, i32, i32) {
    %c0_i32 = arith.constant 0 : i32
    %c0_i32_0 = arith.constant 0 : i32
    %c0_i32_1 = arith.constant 0 : i32
    return %arg0, %c0_i32, %c0_i32_0 : i32, i32, i32
  }
  func.func @transform_1(%arg0: i32) -> (i32, i32, i32) {
    %c0_i32 = arith.constant 0 : i32
    %c0_i32_0 = arith.constant 0 : i32
    %c0_i32_1 = arith.constant 0 : i32
    return %arg0, %c0_i32, %c0_i32_0 : i32, i32, i32
  }
  func.func @transform_2(%arg0: i32) -> (i32, i32, i32) {
    %c0_i32 = arith.constant 0 : i32
    %c0_i32_0 = arith.constant 0 : i32
    %c0_i32_1 = arith.constant 0 : i32
    return %arg0, %c0_i32, %c0_i32_0 : i32, i32, i32
  }
  func.func @transform_3(%arg0: i32) -> (i32, i32, i32) {
    %c0_i32 = arith.constant 0 : i32
    %c0_i32_0 = arith.constant 0 : i32
    %c0_i32_1 = arith.constant 0 : i32
    return %arg0, %c0_i32, %c0_i32_0 : i32, i32, i32
  }
  func.func @transform_4(%arg0: i32) -> (i32, i32) {
    %c0_i32 = arith.constant 0 : i32
    %c0_i32_0 = arith.constant 0 : i32
    %c0_i32_1 = arith.constant 0 : i32
    return %c0_i32, %c0_i32_0 : i32, i32
  }
  func.func @transform_5(%arg0: i32) -> (i32, i32) {
    %c0_i32 = arith.constant 0 : i32
    %c0_i32_0 = arith.constant 0 : i32
    %c0_i32_1 = arith.constant 0 : i32
    return %c0_i32, %c0_i32_0 : i32, i32
  }
  func.func @transform_6(%arg0: i32) -> (i32, i32) {
    %c0_i32 = arith.constant 0 : i32
    %c0_i32_0 = arith.constant 0 : i32
    %c0_i32_1 = arith.constant 0 : i32
    return %c0_i32, %c0_i32_0 : i32, i32
  }
  func.func @transform_7(%arg0: i32) -> (i32, i32) {
    %c0_i32 = arith.constant 0 : i32
    %c0_i32_0 = arith.constant 0 : i32
    %c0_i32_1 = arith.constant 0 : i32
    return %c0_i32, %c0_i32_0 : i32, i32
  }
  func.func @transform_8(%arg0: i32) -> (i32, i32) {
    %c0_i32 = arith.constant 0 : i32
    %c0_i32_0 = arith.constant 0 : i32
    %c0_i32_1 = arith.constant 0 : i32
    return %c0_i32, %c0_i32_0 : i32, i32
  }
  func.func @transform_9(%arg0: i32) -> (i32, i32) {
    %c0_i32 = arith.constant 0 : i32
    %c0_i32_0 = arith.constant 0 : i32
    %c0_i32_1 = arith.constant 0 : i32
    return %c0_i32, %c0_i32_0 : i32, i32
  }
  func.func @transform_10(%arg0: i32) -> (i32, i32) {
    %c0_i32 = arith.constant 0 : i32
    %c0_i32_0 = arith.constant 0 : i32
    %c0_i32_1 = arith.constant 0 : i32
    return %c0_i32, %c0_i32_0 : i32, i32
  }
  func.func @transform_11(%arg0: i32) -> (i32, i32) {
    %c0_i32 = arith.constant 0 : i32
    %c0_i32_0 = arith.constant 0 : i32
    %c0_i32_1 = arith.constant 0 : i32
    return %c0_i32, %c0_i32_0 : i32, i32
  }
  func.func @transform_12(%arg0: i32) -> (i32, i32, i32) {
    %c0_i32 = arith.constant 0 : i32
    %c0_i32_0 = arith.constant 0 : i32
    %c0_i32_1 = arith.constant 0 : i32
    return %arg0, %c0_i32, %c0_i32_0 : i32, i32, i32
  }
  func.func @transform_13(%arg0: i32) -> (i32, i32, i32) {
    %c0_i32 = arith.constant 0 : i32
    %c0_i32_0 = arith.constant 0 : i32
    %c0_i32_1 = arith.constant 0 : i32
    return %arg0, %c0_i32, %c0_i32_0 : i32, i32, i32
  }
}

</mosaic_0001>

<bundles_post_ra>
// kernel: tpu_custom_call.1
= control target key start
LH: loop header
LB: loop body
LE: loop exit
PB: predicated region body
PF: predicated region fallthrough
CT: control target
= control target key end

     0   :  { %s4314_s0 = inlined_call_operand.hbm [shape: f32[2,4,256], index: 0, kind: input, shape index: {}]   ;;  %s4315_s1 = inlined_call_operand.hbm [shape: f32[2,4,256], index: 1, kind: input, shape index: {}]   ;;  %s4316_s2 = inlined_call_operand.hbm [shape: f32[2,4,256], index: 2, kind: input, shape index: {}]   ;;  %s4317_s3 = inlined_call_operand.vmem [shape: f32[2,32,32], index: 3, kind: input, shape index: {}]   ;;  %s4318_s4 = inlined_call_operand.vmem [shape: f32[4,32], index: 4, kind: input, shape index: {}]   ;;  %s4319_s5 = inlined_call_operand.vmem [shape: f32[32,1], index: 5, kind: input, shape index: {}]   ;;  %s4320_s6 = inlined_call_operand.vmem [shape: f32[4,32], index: 6, kind: input, shape index: {}]   ;;  %s4321_s7 = inlined_call_operand.vmem [shape: f32[32,1], index: 7, kind: input, shape index: {}]   ;;  %s4322_s8 = inlined_call_operand.vmem [shape: f32[4,32], index: 8, kind: input, shape index: {}]   ;;  %s4323_s9 = inlined_call_operand.vmem [shape: f32[32,1], index: 9, kind: input, shape index: {}]   ;;  %s4324_s10 = inlined_call_operand.vmem [shape: f32[32,256], index: 10, kind: input, shape index: {}]   ;;  %s4325_s11 = inlined_call_operand.vmem [shape: f32[32,1], index: 11, kind: input, shape index: {}]   ;;  %s4326_s12 = inlined_call_operand.hbm [shape: f32[2,256,256], index: 12, kind: output, shape index: {0}]   ;;  %s4327_s13 = inlined_call_operand.hbm [shape: f32[2,32,32], index: 13, kind: output, shape index: {1}]  }
   0x1   :  { %4374 = sst [smem:[#allocation38_spill]] %s4314_s0 }
   0x2   :  { %4375 = sst [smem:[#allocation39_spill]] %s4315_s1 }
   0x3   :  { %4376 = sst [smem:[#allocation40_spill]] %s4317_s3 }
   0x4   :  { %4377 = sst [smem:[#allocation41_spill]] %s4324_s10 }
   0x5   :  { %4378 = sst [smem:[#allocation42_spill]] %s4325_s11 }
   0x6   :  { %4379 = sst [smem:[#allocation43_spill]] %s4326_s12 }
   0x7   :  { %4380 = sst [smem:[#allocation44_spill]] %s4327_s13 }
   0x8   :  { %19 = vsyncpa [#allocation3], 0 }
   0x9   :  { %21 = vsyncpa [#allocation3 + $0x1], 0 }
   0xa   :  { %22 = vsyncpa [#allocation6], 0 }
   0xb   :  { %24 = vsyncpa [#allocation6 + $0x1], 0 }
   0xc   :  { %25 = vsyncpa [#allocation4], 0 }
   0xd   :  { %27 = vsyncpa [#allocation4 + $0x1], 0 }
   0xe   :  { %28 = vsyncpa [#allocation10], 0 }
   0xf   :  { %30 = vsyncpa [#allocation10 + $0x1], 0  ;;  %s3046_s25 = smov 0   ;;  %s3048_s26 = smov 0  }
  0x10   :  { %s3050_s27 = smov 0   ;;  %s3052_s28 = smov 0  }
  0x11 LB: > { %4381 = sst [smem:[#allocation15_spill]] %s2951_s25  ;;  %s3067_s29 = sadd.s32 4294967295, %s2963_s28   ;;  %s2963_s28 = sphi %s3052_s28, %s4472_s28   ;;  %s2959_s27 = sphi %s3050_s27, %s4474_s27   ;;  %s2955_s26 = sphi %s3048_s26, %s4476_s26   ;;  %s2951_s25 = sphi %s3046_s25, %s4475_s25  }
  0x12   : > { %4382 = sst [smem:[#allocation16_spill]] %s2959_s27  ;;  %s2433_s30 = sadd.s32 4294967294, %s2963_s28  }
  0x13   : > { %s3071_s14 = sadd.s32 1, %s2963_s28   ;;  %s43_s15 = sadd.s32 1, %s2959_s27 }
  0x14   : > { %4383 = sst [smem:[#allocation17_spill]] %s3071_s14  ;;  %s40_s16 = ssub.s32 %s2963_s28, %s3071_s14 }
  0x15   : > { %p50_p0 = scmp.ne.s32.totalorder %s2959_s27, %s2955_s26  ;;  %p41_p1 = scmp.eq.s32.totalorder %s40_s16, 0 }
  0x16   : > { %p51_p2 = scmp.eq.s32.totalorder %s2963_s28, 0  ;;  %p56_p3 = scmp.ne.s32.totalorder %s2955_s26, %s2951_s25 }
  0x17   : > { %p57_p4 = scmp.eq.s32.totalorder %s3067_s29, 0  ;;  %p326_p7 = scmp.eq.s32.totalorder %s3067_s29, 1 }
  0x18   : > { %s3083_s17 = scalar_select %p41_p1, %s2959_s27, %s43_s15  }
  0x19   : > { %p52_p5 = por %p51_p2, %p50_p0  ;;  %p3085_p6 = por %p57_p4, %p56_p3 }
  0x1a   : > { %4384 = sst [smem:[#allocation18_spill]] %s3083_s17  ;;  %p332_p8 = scmp.eq.s32.totalorder %s2433_s30, 1 }
  0x1b   : > { %s4385_s18 = scalar_select %p3085_p6, 1, 0 }
  0x1c   : > { %p2544_p10 = scmp.lt.s32.totalorder %s2963_s28, 2  ;;  %p3092_p11 = por %p326_p7, %p50_p0 }
  0x1d   : > { %p3096_p12 = por %p332_p8, %p56_p3  ;;  %s4331_s21 = sand.u32 1, %s2959_s27  }
  0x1e   : > { %s4386_s19 = scalar_select %p3092_p11, 1, 0 }
  0x1f   : > { %s4388_s20 = scalar_select %p3096_p12, 1, 0 }
  0x20   : > { %4387 = sst [smem:[#allocation19_spill]] %s4386_s19  ;;  %s3102_s22 = sshll.u32 %s2963_s28, 7 }
  0x21   : > { %4389 = sst [smem:[#allocation20_spill]] %s4388_s20  ;;  %s3106_s23 = sshll.u32 %s4331_s21, 3 }
  0x22   : > { %p3108_p13 = pnand %p2544_p10, %p52_p5  ;;  %s421_s30 = sand.u32 1, %s2963_s28  }
  0x23   : > { %s4391_s1 = sld [smem:[#allocation39_spill]]  ;;  %s425_s14 = scalar_lea.vmem [#allocation5], %s3106_s23 }
  0x24   : > { %s433_s20 = sshll.u32 %s425_s14, 4  ;;  %s3121_s21 = scalar_lea.sflag [#allocation6], %s421_s30  ;;  %s434_s20 = int_to_ptr.vmem [resolvable:$true] %s433_s20 }
  0x25   : > { %p3127_p2 = pneg %p3108_p13 }
  0x29   : > { %s3117_s17 = scalar_lea.hbm %s4391_s1, %s3102_s22  ;;  %s2786_s3 = scalar_lea.hbm %s4391_s1, 256 }
  0x2a   : > { %s2781_s25 = scalar_lea.hbm %s3117_s17, 128  ;;  %p2787_p5 = scmp.lt.s32.totalorder %s3117_s17, %s4391_s1 }
  0x2b   : > { %p2782_p1 = scmp.ne.s32.totalorder %s3117_s17, %s2781_s25  ;;  %p2788_p7 = scmp.lt.s32.totalorder %s2786_s3, %s2781_s25 }
  0x2d   : > { %p2784_p3 = pnand %p3127_p2, %p2782_p1  ;;  %p2789_p8 = por %p2788_p7, %p2787_p5 }
  0x2f   : > { %p2785_p4 = pneg %p2784_p3 }
  0x31   : > { %p2790_p10 = pnand %p2789_p8, %p2785_p4 }
  0x33   : > { %2793 = shalt.err (!%p2790_p10)
}
  0x34   : > { %s2794_s30 = scalar_lea.vmem %s434_s20, 128  ;;  %s2965_s19 = smov [#allocation5]  }
  0x35   : > { %p2795_p9 = scmp.ne.s32.totalorder %s434_s20, %s2794_s30  ;;  %s2799_s10 = sshll.u32 %s2965_s19, 4  ;;  %s2800_s10 = int_to_ptr.vmem [resolvable:$false] %s2799_s10 }
  0x36   : > { %s2801_s11 = scalar_lea.vmem %s2800_s10, 256  ;;  %p2802_p1 = scmp.lt.s32.totalorder %s434_s20, %s2800_s10 }
  0x37   : > { %p2797_p0 = pnand %p2795_p9, %p3127_p2  ;;  %p2803_p3 = scmp.lt.s32.totalorder %s2801_s11, %s2794_s30 }
  0x39   : > { %p2798_p12 = pneg %p2797_p0  ;;  %p2804_p11 = por %p2803_p3, %p2802_p1 }
  0x3b   : > { %p2805_p6 = pnand %p2804_p11, %p2798_p12 }
  0x3d   : > { %2808 = shalt.err (!%p2805_p6)
}
  0x3e   : > { %2533 = dma.hbm_to_vmem [thread:$0]  (!%p3108_p13), %s3117_s17, 128, %s434_s20, %s3121_s21  }
  0x3f   : > { %p465_p9 = scmp.lt.s32.totalorder %s2963_s28, 3  ;;  %s4393_s0 = sld [smem:[#allocation38_spill]] }
  0x40   : > { %p4394_p0 = scmp.ge.s32.totalorder %s2963_s28, 1  ;;  %s406_s25 = scalar_lea.vmem [#allocation2], %s3106_s23 }
  0x41   : > { %s414_s19 = sshll.u32 %s406_s25, 4  ;;  %s4396_s15 = sand.u32 1, %s2959_s27   ;;  %s415_s19 = int_to_ptr.vmem [resolvable:$true] %s414_s19 }
  0x42   : > { %p3155_p6 = pnand %p4394_p0, %p465_p9  ;;  %s403_s16 = scalar_lea.sflag [#allocation3], %s4396_s15 }
  0x44   : > { %s4395_s11 = scalar_select %p3155_p6, 1, 0 }
  0x45   : > { %s3151_s10 = scalar_lea.hbm %s4393_s0, %s3102_s22  ;;  %s2814_s30 = scalar_lea.hbm %s4393_s0, 256 }
  0x46   : > { %s2809_s17 = scalar_lea.hbm %s3151_s10, 128  ;;  %p2815_p5 = scmp.lt.s32.totalorder %s3151_s10, %s4393_s0 }
  0x47   : > { %p2810_p11 = scmp.ne.s32.totalorder %s3151_s10, %s2809_s17  ;;  %p2816_p7 = scmp.lt.s32.totalorder %s2814_s30, %s2809_s17 }
  0x49   : > { %p2812_p12 = pnand %p2810_p11, %p3127_p2  ;;  %p2817_p8 = por %p2816_p7, %p2815_p5 }
  0x4b   : > { %p2813_p4 = pneg %p2812_p12 }
  0x4d   : > { %p2818_p10 = pnand %p2817_p8, %p2813_p4 }
  0x4f   : > { %2821 = shalt.err (!%p2818_p10)
}
  0x50   : > { %s2822_s25 = scalar_lea.vmem %s415_s19, 128  ;;  %s2966_s15 = smov [#allocation2]  }
  0x51   : > { %p2823_p1 = scmp.ne.s32.totalorder %s415_s19, %s2822_s25  ;;  %s2827_s1 = sshll.u32 %s2966_s15, 4  ;;  %s2828_s1 = int_to_ptr.vmem [resolvable:$false] %s2827_s1 }
  0x52   : > { %s2829_s27 = scalar_lea.vmem %s2828_s1, 256  ;;  %p2830_p0 = scmp.lt.s32.totalorder %s415_s19, %s2828_s1 }
  0x53   : > { %p2825_p3 = pnand %p2823_p1, %p3127_p2  ;;  %p2831_p11 = scmp.lt.s32.totalorder %s2829_s27, %s2822_s25 }
  0x55   : > { %p2826_p9 = pneg %p2825_p3  ;;  %p2832_p12 = por %p2831_p11, %p2830_p0 }
  0x57   : > { %p2833_p6 = pnand %p2832_p12, %p2826_p9 }
  0x59   : > { %2836 = shalt.err (!%p2833_p6)
}
  0x5a   : > { %2530 = dma.hbm_to_vmem [thread:$0]  (!%p3108_p13), %s3151_s10, 128, %s415_s19, %s403_s16  }
  0x5b   : > { %s450_s14 = scalar_lea.hbm %s4316_s2, %s3102_s22  ;;  %s444_s30 = scalar_lea.vmem [#allocation7], %s3106_s23 }
  0x5c   : > { %s452_s3 = sshll.u32 %s444_s30, 4  ;;  %s2837_s12 = scalar_lea.hbm %s450_s14, 128  ;;  %s453_s3 = int_to_ptr.vmem [resolvable:$true] %s452_s3 }
  0x5d   : > { %p2838_p4 = scmp.ne.s32.totalorder %s450_s14, %s2837_s12  ;;  %s2842_s25 = scalar_lea.hbm %s4316_s2, 256 }
  0x5e   : > { %p2843_p6 = scmp.lt.s32.totalorder %s450_s14, %s4316_s2  ;;  %p2844_p8 = scmp.lt.s32.totalorder %s2842_s25, %s2837_s12 }
  0x5f   : > { %p2840_p5 = pnand %p2838_p4, %p3127_p2 }
  0x60   : > { %p2845_p10 = por %p2844_p8, %p2843_p6 }
  0x61   : > { %p2841_p7 = pneg %p2840_p5 }
  0x63   : > { %p2846_p1 = pnand %p2845_p10, %p2841_p7 }
  0x65   : > { %2849 = shalt.err (!%p2846_p1)
}
  0x66   : > { %s2850_s22 = scalar_lea.vmem %s453_s3, 128  ;;  %s2967_s23 = smov [#allocation7]  }
  0x67   : > { %p2851_p3 = scmp.ne.s32.totalorder %s453_s3, %s2850_s22  ;;  %s2855_s10 = sshll.u32 %s2967_s23, 4  ;;  %s2856_s10 = int_to_ptr.vmem [resolvable:$false] %s2855_s10 }
  0x68   : > { %s2857_s19 = scalar_lea.vmem %s2856_s10, 256  ;;  %p2858_p11 = scmp.lt.s32.totalorder %s453_s3, %s2856_s10 }
  0x69   : > { %p2853_p9 = pnand %p2851_p3, %p3127_p2  ;;  %p2859_p12 = scmp.lt.s32.totalorder %s2857_s19, %s2850_s22 }
  0x6b   : > { %p2854_p0 = pneg %p2853_p9  ;;  %p2860_p4 = por %p2859_p12, %p2858_p11 }
  0x6d   : > { %p2861_p5 = pnand %p2860_p4, %p2854_p0 }
  0x6f   : > { %2864 = shalt.err (!%p2861_p5)
}
  0x70   : > { %2536 = dma.hbm_to_vmem [thread:$0]  (!%p3108_p13), %s450_s14, 128, %s453_s3, %s3121_s21  }
  0x71   : > { %p4397_p7 = scmp.ne.s32.totalorder %s4395_s11, 0 }
  0x73   : > { %469 = sbr.rel (%p4397_p7) target bundleno = 1733 (0x6c5), region = 68 }
  0x78   : > { %s3199_s0 = sand.u32 1, %s2955_s26   ;;  %p4398_p2 = scmp.ne.s32.totalorder %s4385_s18, 0 }
  0x79   : > { %s3202_s13 = sshll.u32 %s3199_s0, 3  ;;  %s472_s16 = scalar_lea.sflag [#allocation3], %s3199_s0 }
  0x7a   : > { %s475_s17 = scalar_lea.vmem [#allocation2], %s3202_s13 }
  0x7b   : > { %2934 = dma.done.wait (%p4398_p2), %s472_s16, 128  }
  0x7c   : > { %2936 = vsyncadd (%p4398_p2), %s472_s16, 4294967168  ;;  %s480_s21 = sand.u32 1, %s3067_s29   ;;  %s484_s11 = scalar_lea.vmem [#allocation5], %s3202_s13 }
  0x7d   : > { %s481_s24 = scalar_lea.sflag [#allocation6], %s480_s21 }
  0x7e   : > { %2938 = dma.done.wait (%p4398_p2), %s481_s24, 256  }
  0x7f   : > { %2940 = vsyncadd (%p4398_p2), %s481_s24, 4294967040  ;;  %v4342_v0 = vmov 0.0   ;;  %v564_v1 = vld [vmem:[%s4318_s4] sm:$0xf]  ;;  %vm636_vm0 = vcmask 1043456   ;;  %v562_v4 = vld [vmem:[%s484_s11] sm:$0xff] }
  0x80   : > { %705 = vmatprep.mubr.f32.mxu0 %v4342_v0  ;;  %1283 = vmatprep.mubr.f32.mxu1 %v4342_v0  ;;  %v561_v2 = vld [vmem:[%s475_s17] sm:$0xff]  ;;  %v788_v5 = vcombine.high %v562_v4, %v562_v4  ;;  %v2969_v8 = vmov 0   ;;  %v567_v10 = vld [vmem:[%s4319_s5 + $0x10] sm:$0xff]  ;;  %v568_v11 = vld [vmem:[%s4319_s5 + $0x18] sm:$0xff]  ;;  %vm623_vm1 = vcmask 31744   ;;  %vm1122_vm2 = vcmask 261120  }
  0x81   : > { %589 = vxpose.xlu0.b32.start.end [1/1] (short) (narrow) %v564_v1, 32  ;;  %v622_v3 = vcombine.high %v561_v2, %v561_v2  ;;  %v730_v6 = vld [vmem:[%s4320_s6] sm:$0xf]  ;;  %2584 = vset.pattern.permute.xlu1 %v2969_v8  ;;  %v566_v9 = vld [vmem:[%s4319_s5 + $0x8] sm:$0xff]  ;;  %v734_v12 = vld [vmem:[%s4321_s7 + $0x18] sm:$0xff]  ;;  %s493_s14 = scalar_lea.vmem [#allocation7], %s3202_s13 }
  0x82   : > { %v565_v7 = vld [vmem:[%s4319_s5] sm:$0xff]  ;;  %v732_v13 = vld [vmem:[%s4321_s7 + $0x8] sm:$0xff]  ;;  %v733_v15 = vld [vmem:[%s4321_s7 + $0x10] sm:$0xff]  ;;  %s4439_s19 = sld [smem:[#allocation42_spill]]  ;;  %s2449_s16 = sshll.u32 %s3199_s0, 9 }
  0x83   : > { %2453 = vmatprep.subr.msk.mxu0 %vm636_vm0, %v622_v3  ;;  %571 = vperm.xlu1 %2584, %v565_v7   ;;  %v731_v14 = vld [vmem:[%s4321_s7] sm:$0xff]  ;;  %s3813_s20 = scalar_lea.vmem [#allocation8], %s2449_s16  ;;  %s4455_s3 = sld [smem:[#allocation41_spill]] }
  0x84   : > { %2454 = vmatpush1.msk.msra.mxu0 %vm636_vm0, %v561_v2  ;;  %s4462_s13 = sld [smem:[#allocation19_spill]]  ;;  %s2515_s18 = sshll.u32 %s3067_s29, 13 }
  0x85   : > { %2459 = vmatprep.subr.msk.mxu0 %vm636_vm0, %v788_v5  ;;  %s2257_s30 = sshll.u32 %s3813_s20, 4  ;;  %s4463_s27 = sld [smem:[#allocation43_spill]]  ;;  %s4230_s30 = int_to_ptr.vmem [resolvable:$true] %s2257_s30 }
  0x86   : > { %s2239_s22 = scalar_lea.sflag [#allocation4], %s3199_s0  ;;  %s2865_s23 = scalar_lea.vmem %s4230_s30, 8192 }
  0x87   : > { %576 = vperm.xlu1 %2584, %v566_v9   ;;  %p2866_p13 = scmp.ne.s32.totalorder %s4230_s30, %s2865_s23  ;;  %s2970_s10 = smov [#allocation8]  }
  0x88   : > { %s2869_s16 = sshll.u32 %s2970_s10, 4  ;;  %s2870_s16 = int_to_ptr.vmem [resolvable:$false] %s2869_s16 }
  0x89   : > { %p2872_p1 = scmp.lt.s32.totalorder %s4230_s30, %s2870_s16 }
  0x8a   : > { %p4465_p6 = scmp.ne.s32.totalorder %s4462_s13, 0 }
  0x8b   : > { %581 = vperm.xlu1 %2584, %v567_v10   ;;  %s4464_s15 = smov %s4463_s27  ;;  %s4228_s25 = scalar_lea.hbm %s4463_s27, %s2515_s18 }
  0x8c   : > { %p2867_p8 = pnand %p2866_p13, %p4465_p6 }
  0x8e   : > { %755 = vxpose.xlu0.b32.start.end [1/1] (short) (narrow) %v730_v6, 32  ;;  %p2868_p10 = pneg %p2867_p8 }
  0x8f   : > { %586 = vperm.xlu1 %2584, %v568_v11  }
  0x93   : > { %752 = vperm.xlu1 %2584, %v734_v12  }
  0x97   : > { %742 = vperm.xlu1 %2584, %v732_v13  }
  0x9b   : > { %737 = vperm.xlu1 %2584, %v731_v14  }
  0xb7   : > { %2585 = vset.pattern.permute.xlu0 %v2969_v8 }
  0xc3   : > { %747 = vperm.xlu0 %2585, %v733_v15  }
  0xfd   : > { %v605_v16 = vpop.trf.xlu0 }
  0xfe   : > { %2455 = vmatmul.mubr.msk.f32.vlgmr.msra.gmra.mxu0 %vm623_vm1, %v605_v16  ;;  %v572_v24 = vpop.permute.xlu1 %571 }
  0xff   : > { %711 = vmatprep.mubr.f32.mxu0 %v4342_v0  ;;  %2460 = vmatpush1.msk.msra.mxu0 %vm636_vm0, %v562_v4 }
 0x101   : > { %v606_v17 = vpop.trf.xlu0 }
 0x102   : > { %2456 = vmatmul.mubr.msk.f32.gmra.mxu0 %vm623_vm1, %v606_v17  ;;  %v577_v25 = vpop.permute.xlu1 %576 }
 0x103   : > { %717 = vmatprep.mubr.f32.mxu0 %v4342_v0 }
 0x105   : > { %v607_v18 = vpop.trf.xlu0 }
 0x106   : > { %2457 = vmatmul.mubr.msk.f32.gmra.mxu0 %vm623_vm1, %v607_v18  ;;  %v582_v32 = vpop.permute.xlu1 %581 }
 0x107   : > { %723 = vmatprep.mubr.f32.mxu0 %v4342_v0 }
 0x109   : > { %v608_v19 = vpop.trf.xlu0 }
 0x10a   : > { %2458 = vmatmul.mubr.msk.f32.gmra.mxu0 %vm623_vm1, %v608_v19  ;;  %v587_v39 = vpop.permute.xlu1 %586 }
 0x10b   : > { %869 = vmatprep.mubr.f32.mxu0 %v4342_v0 }
 0x10d   : > { %v771_v20 = vpop.trf.xlu0 }
 0x10e   : > { %2461 = vmatmul.mubr.msk.f32.vlgmr.msra.gmra.mxu0 %vm623_vm1, %v771_v20  ;;  %v753_v48 = vpop.permute.xlu1 %752 }
 0x10f   : > { %875 = vmatprep.mubr.f32.mxu0 %v4342_v0 }
 0x111   : > { %v772_v21 = vpop.trf.xlu0 }
 0x112   : > { %2462 = vmatmul.mubr.msk.f32.gmra.mxu0 %vm623_vm1, %v772_v21  ;;  %v743_v53 = vpop.permute.xlu1 %742 }
 0x113   : > { %881 = vmatprep.mubr.f32.mxu0 %v4342_v0 }
 0x115   : > { %v773_v22 = vpop.trf.xlu0 }
 0x116   : > { %2463 = vmatmul.mubr.msk.f32.gmra.mxu0 %vm623_vm1, %v773_v22  ;;  %v738_v60 = vpop.permute.xlu1 %737 }
 0x117   : > { %887 = vmatprep.mubr.f32.mxu0 %v4342_v0 }
 0x119   : > { %v774_v23 = vpop.trf.xlu0 }
 0x11a   : > { %2464 = vmatmul.mubr.msk.f32.gmra.mxu0 %vm623_vm1, %v774_v23 }
 0x11b   : > { %1033 = vmatprep.mubr.f32.mxu0 %v4342_v0 }
 0x13e   : > { %v748_v52 = vpop.permute.xlu0 %747 }
 0x1be   : > { %v707_v26 = vpop.f32.mrf.mxu0 }
 0x1bf   : > { %v708_v27 = vadd.f32 %v707_v26, %v572_v24 }
 0x1c0   : > { %v709_v28 = vpop.f32.mrf.mxu0 }
 0x1c1   : > { %v710_v29 = vadd.f32 %v709_v28, %v572_v24  ;;  %1058 = vxpose.xlu1.b32.start [1/4] (short) %v708_v27, 128 }
 0x1c2   : > { %v713_v30 = vpop.f32.mrf.mxu0 }
 0x1c3   : > { %v714_v31 = vadd.f32 %v713_v30, %v577_v25  ;;  %1090 = vxpose.xlu0.b32.start [1/4] (short) %v710_v29, 128 }
 0x1c4   : > { %v715_v33 = vpop.f32.mrf.mxu0 }
 0x1c5   : > { %v716_v34 = vadd.f32 %v715_v33, %v577_v25  ;;  %1059 = vxpose.xlu1.b32.cont [2/4] (short) %v714_v31, 128 }
 0x1c6   : > { %v719_v35 = vpop.f32.mrf.mxu0 }
 0x1c7   : > { %v720_v36 = vadd.f32 %v719_v35, %v582_v32  ;;  %1091 = vxpose.xlu0.b32.cont [2/4] (short) %v716_v34, 128 }
 0x1c8   : > { %v721_v37 = vpop.f32.mrf.mxu0 }
 0x1c9   : > { %v722_v38 = vadd.f32 %v721_v37, %v582_v32  ;;  %1060 = vxpose.xlu1.b32.cont [3/4] (short) %v720_v36, 128 }
 0x1ca   : > { %v725_v40 = vpop.f32.mrf.mxu0 }
 0x1cb   : > { %v726_v41 = vadd.f32 %v725_v40, %v587_v39  ;;  %1092 = vxpose.xlu0.b32.cont [3/4] (short) %v722_v38, 128 }
 0x1cc   : > { %v727_v42 = vpop.f32.mrf.mxu0 }
 0x1cd   : > { %v728_v43 = vadd.f32 %v727_v42, %v587_v39  ;;  %1061 = vxpose.xlu1.b32.end [4/4] (short) %v726_v41, 128 }
 0x1ce   : > { %v871_v44 = vpop.f32.mrf.mxu0 }
 0x1cf   : > { %1093 = vxpose.xlu0.b32.end [4/4] (short) %v728_v43, 128  ;;  %v872_v63 = vadd.f32 %v871_v44, %v738_v60 }
 0x1d0   : > { %v873_v45 = vpop.f32.mrf.mxu0 }
 0x1d1   : > { %v874_v62 = vadd.f32 %v873_v45, %v738_v60 }
 0x1d2   : > { %v877_v46 = vpop.f32.mrf.mxu0 }
 0x1d3   : > { %v878_v61 = vadd.f32 %v877_v46, %v743_v53 }
 0x1d4   : > { %v879_v47 = vpop.f32.mrf.mxu0 }
 0x1d5   : > { %v880_v59 = vadd.f32 %v879_v47, %v743_v53 }
 0x1d6   : > { %v883_v49 = vpop.f32.mrf.mxu0 }
 0x1d7   : > { %v884_v58 = vadd.f32 %v883_v49, %v748_v52 }
 0x1d8   : > { %v885_v50 = vpop.f32.mrf.mxu0 }
 0x1d9   : > { %v886_v55 = vadd.f32 %v885_v50, %v748_v52 }
 0x1da   : > { %v889_v51 = vpop.f32.mrf.mxu0 }
 0x1db   : > { %v890_v57 = vadd.f32 %v889_v51, %v753_v48 }
 0x1dc   : > { %v891_v54 = vpop.f32.mrf.mxu0 }
 0x1dd   : > { %v892_v56 = vadd.f32 %v891_v54, %v753_v48 }
 0x1df   : > { %1243 = vmatprep.subr.mxu1 %v892_v56 }
 0x1e0   : > { %1244 = vmatpush1.msra.mxu1 %v890_v57 }
 0x1e1   : > { %1245 = vmatprep.subr.mxu1 %v886_v55 }
 0x1e2   : > { %1246 = vmatpush1.msra.mxu1 %v884_v58 }
 0x1e3   : > { %1247 = vmatprep.subr.mxu1 %v880_v59 }
 0x1e4   : > { %1248 = vmatpush1.msra.mxu1 %v878_v61 }
 0x1e5   : > { %1249 = vmatprep.subr.mxu1 %v874_v62 }
 0x1e6   : > { %1250 = vmatpush1.msra.mxu1 %v872_v63 }
 0x23d   : > { %v1074_v1 = vpop.trf.xlu1 }
 0x23e   : > { %2471 = vmatmul.mubr.msk.f32.vlgmr.msra.gmra.mxu1 %vm1122_vm2, %v1074_v1 }
 0x23f   : > { %1289 = vmatprep.mubr.f32.mxu1 %v4342_v0  ;;  %v1106_v10 = vpop.trf.xlu0 }
 0x241   : > { %v1075_v2 = vpop.trf.xlu1 }
 0x242   : > { %2472 = vmatmul.mubr.msk.f32.gmra.mxu1 %vm1122_vm2, %v1075_v2 }
 0x243   : > { %1295 = vmatprep.mubr.f32.mxu1 %v4342_v0  ;;  %v1107_v12 = vpop.trf.xlu0 }
 0x245   : > { %v1076_v3 = vpop.trf.xlu1 }
 0x246   : > { %2473 = vmatmul.mubr.msk.f32.gmra.mxu1 %vm1122_vm2, %v1076_v3 }
 0x247   : > { %1301 = vmatprep.mubr.f32.mxu1 %v4342_v0  ;;  %v1108_v15 = vpop.trf.xlu0 }
 0x249   : > { %v1077_v4 = vpop.trf.xlu1 }
 0x24a   : > { %2474 = vmatmul.mubr.msk.f32.gmra.mxu1 %vm1122_vm2, %v1077_v4 }
 0x24b   : > { %1307 = vmatprep.mubr.f32.mxu1 %v4342_v0  ;;  %v1109_v17 = vpop.trf.xlu0 }
 0x24d   : > { %v1078_v5 = vpop.trf.xlu1 }
 0x24e   : > { %2475 = vmatmul.mubr.msk.f32.gmra.mxu1 %vm1122_vm2, %v1078_v5 }
 0x24f   : > { %1313 = vmatprep.mubr.f32.mxu1 %v4342_v0  ;;  %v1110_v20 = vpop.trf.xlu0 }
 0x251   : > { %v1079_v6 = vpop.trf.xlu1 }
 0x252   : > { %2476 = vmatmul.mubr.msk.f32.gmra.mxu1 %vm1122_vm2, %v1079_v6 }
 0x253   : > { %1319 = vmatprep.mubr.f32.mxu1 %v4342_v0  ;;  %v1111_v22 = vpop.trf.xlu0 }
 0x255   : > { %v1080_v7 = vpop.trf.xlu1 }
 0x256   : > { %2477 = vmatmul.mubr.msk.f32.gmra.mxu1 %vm1122_vm2, %v1080_v7 }
 0x257   : > { %1325 = vmatprep.mubr.f32.mxu1 %v4342_v0  ;;  %v1112_v23 = vpop.trf.xlu0 }
 0x259   : > { %v1081_v8 = vpop.trf.xlu1 }
 0x25a   : > { %2478 = vmatmul.mubr.msk.f32.gmra.mxu1 %vm1122_vm2, %v1081_v8 }
 0x25b   : > { %1331 = vmatprep.mubr.f32.mxu1 %v4342_v0  ;;  %v1113_v24 = vpop.trf.xlu0 }
 0x25d   : > { %v1082_v9 = vpop.trf.xlu1 }
 0x25e   : > { %2479 = vmatmul.mubr.msk.f32.gmra.mxu1 %vm1122_vm2, %v1082_v9 }
 0x25f   : > { %1337 = vmatprep.mubr.f32.mxu1 %v4342_v0  ;;  %v1114_v25 = vpop.trf.xlu0 }
 0x261   : > { %v1083_v11 = vpop.trf.xlu1 }
 0x262   : > { %2480 = vmatmul.mubr.msk.f32.gmra.mxu1 %vm1122_vm2, %v1083_v11 }
 0x263   : > { %1343 = vmatprep.mubr.f32.mxu1 %v4342_v0  ;;  %v1115_v26 = vpop.trf.xlu0 }
 0x265   : > { %v1084_v13 = vpop.trf.xlu1 }
 0x266   : > { %2481 = vmatmul.mubr.msk.f32.gmra.mxu1 %vm1122_vm2, %v1084_v13 }
 0x267   : > { %1349 = vmatprep.mubr.f32.mxu1 %v4342_v0  ;;  %v1116_v27 = vpop.trf.xlu0 }
 0x269   : > { %v1085_v14 = vpop.trf.xlu1 }
 0x26a   : > { %2482 = vmatmul.mubr.msk.f32.gmra.mxu1 %vm1122_vm2, %v1085_v14 }
 0x26b   : > { %1355 = vmatprep.mubr.f32.mxu1 %v4342_v0  ;;  %v1117_v28 = vpop.trf.xlu0 }
 0x26d   : > { %v1086_v16 = vpop.trf.xlu1 }
 0x26e   : > { %2483 = vmatmul.mubr.msk.f32.gmra.mxu1 %vm1122_vm2, %v1086_v16 }
 0x26f   : > { %1361 = vmatprep.mubr.f32.mxu1 %v4342_v0  ;;  %v1118_v29 = vpop.trf.xlu0 }
 0x271   : > { %v1087_v18 = vpop.trf.xlu1 }
 0x272   : > { %2484 = vmatmul.mubr.msk.f32.gmra.mxu1 %vm1122_vm2, %v1087_v18 }
 0x273   : > { %1367 = vmatprep.mubr.f32.mxu1 %v4342_v0  ;;  %v1119_v30 = vpop.trf.xlu0 }
 0x275   : > { %v1088_v19 = vpop.trf.xlu1 }
 0x276   : > { %2485 = vmatmul.mubr.msk.f32.gmra.mxu1 %vm1122_vm2, %v1088_v19 }
 0x277   : > { %1373 = vmatprep.mubr.f32.mxu1 %v4342_v0  ;;  %v1120_v31 = vpop.trf.xlu0 }
 0x279   : > { %v1089_v21 = vpop.trf.xlu1 }
 0x27a   : > { %2486 = vmatmul.mubr.msk.f32.gmra.mxu1 %vm1122_vm2, %v1089_v21 }
 0x27b   : > { %1379 = vmatprep.mubr.f32.mxu1 %v4342_v0  ;;  %v1121_v32 = vpop.trf.xlu0 }
 0x27e   : > { %2487 = vmatmul.mubr.msk.f32.gmra.mxu1 %vm1122_vm2, %v1106_v10 }
 0x27f   : > { %1385 = vmatprep.mubr.f32.mxu1 %v4342_v0 }
 0x282   : > { %2488 = vmatmul.mubr.msk.f32.gmra.mxu1 %vm1122_vm2, %v1107_v12 }
 0x283   : > { %1391 = vmatprep.mubr.f32.mxu1 %v4342_v0 }
 0x286   : > { %2489 = vmatmul.mubr.msk.f32.gmra.mxu1 %vm1122_vm2, %v1108_v15 }
 0x287   : > { %1397 = vmatprep.mubr.f32.mxu1 %v4342_v0 }
 0x28a   : > { %2490 = vmatmul.mubr.msk.f32.gmra.mxu1 %vm1122_vm2, %v1109_v17 }
 0x28b   : > { %1403 = vmatprep.mubr.f32.mxu1 %v4342_v0 }
 0x28e   : > { %2491 = vmatmul.mubr.msk.f32.gmra.mxu1 %vm1122_vm2, %v1110_v20 }
 0x28f   : > { %1409 = vmatprep.mubr.f32.mxu1 %v4342_v0 }
 0x292   : > { %2492 = vmatmul.mubr.msk.f32.gmra.mxu1 %vm1122_vm2, %v1111_v22 }
 0x293   : > { %1415 = vmatprep.mubr.f32.mxu1 %v4342_v0 }
 0x296   : > { %2493 = vmatmul.mubr.msk.f32.gmra.mxu1 %vm1122_vm2, %v1112_v23 }
 0x297   : > { %1421 = vmatprep.mubr.f32.mxu1 %v4342_v0 }
 0x29a   : > { %2494 = vmatmul.mubr.msk.f32.gmra.mxu1 %vm1122_vm2, %v1113_v24 }
 0x29b   : > { %1427 = vmatprep.mubr.f32.mxu1 %v4342_v0 }
 0x29e   : > { %2495 = vmatmul.mubr.msk.f32.gmra.mxu1 %vm1122_vm2, %v1114_v25 }
 0x29f   : > { %1433 = vmatprep.mubr.f32.mxu1 %v4342_v0 }
 0x2a2   : > { %2496 = vmatmul.mubr.msk.f32.gmra.mxu1 %vm1122_vm2, %v1115_v26 }
 0x2a3   : > { %1439 = vmatprep.mubr.f32.mxu1 %v4342_v0 }
 0x2a6   : > { %2497 = vmatmul.mubr.msk.f32.gmra.mxu1 %vm1122_vm2, %v1116_v27 }
 0x2a7   : > { %1445 = vmatprep.mubr.f32.mxu1 %v4342_v0 }
 0x2aa   : > { %2498 = vmatmul.mubr.msk.f32.gmra.mxu1 %vm1122_vm2, %v1117_v28 }
 0x2ab   : > { %1451 = vmatprep.mubr.f32.mxu1 %v4342_v0 }
 0x2ae   : > { %2499 = vmatmul.mubr.msk.f32.gmra.mxu1 %vm1122_vm2, %v1118_v29 }
 0x2af   : > { %1457 = vmatprep.mubr.f32.mxu1 %v4342_v0 }
 0x2b2   : > { %2500 = vmatmul.mubr.msk.f32.gmra.mxu1 %vm1122_vm2, %v1119_v30 }
 0x2b3   : > { %1463 = vmatprep.mubr.f32.mxu1 %v4342_v0 }
 0x2b6   : > { %2501 = vmatmul.mubr.msk.f32.gmra.mxu1 %vm1122_vm2, %v1120_v31 }
 0x2b7   : > { %1469 = vmatprep.mubr.f32.mxu1 %v4342_v0 }
 0x2ba   : > { %2502 = vmatmul.mubr.msk.f32.gmra.mxu1 %vm1122_vm2, %v1121_v32 }
 0x2fe   : > { %v3331_v33 = vpop.f32.mrf.mxu1 }
 0x2ff   : > { %4399 = vst [vmem:[#allocation21_spill] sm:$0xff] %v3331_v33 }
 0x300   : > { %v3333_v34 = vpop.f32.mrf.mxu1 }
 0x301   : > { %4400 = vst [vmem:[#allocation22_spill] sm:$0xff] %v3333_v34 }
 0x302   : > { %v3335_v35 = vpop.f32.mrf.mxu1 }
 0x303   : > { %4401 = vst [vmem:[#allocation23_spill] sm:$0xff] %v3335_v35 }
 0x304   : > { %v3337_v36 = vpop.f32.mrf.mxu1 }
 0x305   : > { %4402 = vst [vmem:[#allocation24_spill] sm:$0xff] %v3337_v36  ;;  %v1479_v10 = vmax.f32 %v3335_v35, %v3337_v36 }
 0x306   : > { %v3339_v37 = vpop.f32.mrf.mxu1 }
 0x308   : > { %v3341_v38 = vpop.f32.mrf.mxu1 }
 0x30a   : > { %v3343_v39 = vpop.f32.mrf.mxu1 }
 0x30c   : > { %v3345_v40 = vpop.f32.mrf.mxu1 }
 0x30d   : > { %4403 = vst [vmem:[#allocation25_spill] sm:$0xff] %v3345_v40  ;;  %v1485_v6 = vmax.f32 %v3343_v39, %v3345_v40 }
 0x30e   : > { %v3347_v41 = vpop.f32.mrf.mxu1 }
 0x310   : > { %v3349_v42 = vpop.f32.mrf.mxu1 }
 0x311   : > { %v1488_v31 = vmax.f32 %v3347_v41, %v3349_v42 }
 0x312   : > { %v3351_v43 = vpop.f32.mrf.mxu1 }
 0x314   : > { %v3353_v44 = vpop.f32.mrf.mxu1 }
 0x315   : > { %v1491_v25 = vmax.f32 %v3351_v43, %v3353_v44 }
 0x316   : > { %v3355_v45 = vpop.f32.mrf.mxu1 }
 0x318   : > { %v3357_v46 = vpop.f32.mrf.mxu1 }
 0x319   : > { %v1494_v22 = vmax.f32 %v3355_v45, %v3357_v46 }
 0x31a   : > { %v3359_v47 = vpop.f32.mrf.mxu1 }
 0x31c   : > { %v3361_v48 = vpop.f32.mrf.mxu1 }
 0x31d   : > { %v1497_v19 = vmax.f32 %v3359_v47, %v3361_v48 }
 0x31e   : > { %v3363_v49 = vpop.f32.mrf.mxu1 }
 0x320   : > { %v3365_v50 = vpop.f32.mrf.mxu1 }
 0x321   : > { %v1500_v16 = vmax.f32 %v3363_v49, %v3365_v50 }
 0x322   : > { %v3367_v51 = vpop.f32.mrf.mxu1 }
 0x324   : > { %v3369_v52 = vpop.f32.mrf.mxu1 }
 0x325   : > { %v1503_v13 = vmax.f32 %v3367_v51, %v3369_v52 }
 0x326   : > { %v3371_v53 = vpop.f32.mrf.mxu1 }
 0x328   : > { %v3373_v54 = vpop.f32.mrf.mxu1 }
 0x329   : > { %v1506_v9 = vmax.f32 %v3371_v53, %v3373_v54 }
 0x32a   : > { %v3375_v55 = vpop.f32.mrf.mxu1 }
 0x32c   : > { %v3377_v56 = vpop.f32.mrf.mxu1 }
 0x32d   : > { %v1509_v5 = vmax.f32 %v3375_v55, %v3377_v56 }
 0x32e   : > { %v3379_v57 = vpop.f32.mrf.mxu1 }
 0x330   : > { %v3381_v58 = vpop.f32.mrf.mxu1 }
 0x331   : > { %v1512_v1 = vmax.f32 %v3379_v57, %v3381_v58 }
 0x332   : > { %v3383_v59 = vpop.f32.mrf.mxu1 }
 0x334   : > { %v3385_v60 = vpop.f32.mrf.mxu1 }
 0x335   : > { %v1515_v61 = vmax.f32 %v3383_v59, %v3385_v60 }
 0x336   : > { %v3389_v62 = vpop.f32.mrf.mxu1 }
 0x337   : > { %1516 = vmax.xlane.f32.xlu1 %v1515_v61 }
 0x338   : > { %v3391_v63 = vpop.f32.mrf.mxu1 }
 0x339   : > { %v1518_v2 = vmax.f32 %v3389_v62, %v3391_v63 }
 0x33a   : > { %v3397_v3 = vpop.f32.mrf.mxu1 }
 0x33b   : > { %1513 = vmax.xlane.f32.xlu1 %v1512_v1  ;;  %1519 = vmax.xlane.f32.xlu0 %v1518_v2  ;;  %v1482_v1 = vmax.f32 %v3339_v37, %v3341_v38 }
 0x33c   : > { %v3399_v4 = vpop.f32.mrf.mxu1 }
 0x33d   : > { %v1521_v28 = vmax.f32 %v3397_v3, %v3399_v4 }
 0x33e   : > { %v3405_v7 = vpop.f32.mrf.mxu1 }
 0x33f   : > { %4404 = vst [vmem:[#allocation26_spill] sm:$0xff] %v3405_v7  ;;  %1510 = vmax.xlane.f32.xlu1 %v1509_v5  ;;  %1486 = vmax.xlane.f32.xlu0 %v1485_v6  ;;  %v1476_v6 = vmax.f32 %v3331_v33, %v3333_v34 }
 0x340   : > { %v3407_v8 = vpop.f32.mrf.mxu1 }
 0x341   : > { %4405 = vst [vmem:[#allocation27_spill] sm:$0xff] %v3407_v8 }
 0x342   : > { %v3413_v11 = vpop.f32.mrf.mxu1 }
 0x343   : > { %4406 = vst [vmem:[#allocation28_spill] sm:$0xff] %v3413_v11  ;;  %1507 = vmax.xlane.f32.xlu1 %v1506_v9  ;;  %1480 = vmax.xlane.f32.xlu0 %v1479_v10 }
 0x344   : > { %v3415_v12 = vpop.f32.mrf.mxu1 }
 0x345   : > { %4407 = vst [vmem:[#allocation29_spill] sm:$0xff] %v3415_v12 }
 0x346   : > { %v3419_v14 = vpop.f32.mrf.mxu1 }
 0x347   : > { %4408 = vst [vmem:[#allocation30_spill] sm:$0xff] %v3419_v14  ;;  %1504 = vmax.xlane.f32.xlu1 %v1503_v13 }
 0x348   : > { %v3421_v15 = vpop.f32.mrf.mxu1 }
 0x349   : > { %4409 = vst [vmem:[#allocation31_spill] sm:$0xff] %v3421_v15 }
 0x34a   : > { %v3425_v17 = vpop.f32.mrf.mxu1 }
 0x34b   : > { %4410 = vst [vmem:[#allocation32_spill] sm:$0xff] %v3425_v17  ;;  %1501 = vmax.xlane.f32.xlu1 %v1500_v16 }
 0x34c   : > { %v3427_v18 = vpop.f32.mrf.mxu1 }
 0x34d   : > { %4411 = vst [vmem:[#allocation33_spill] sm:$0xff] %v3427_v18 }
 0x34e   : > { %v3431_v20 = vpop.f32.mrf.mxu1 }
 0x34f   : > { %4412 = vst [vmem:[#allocation34_spill] sm:$0xff] %v3431_v20  ;;  %1498 = vmax.xlane.f32.xlu1 %v1497_v19 }
 0x350   : > { %v3433_v21 = vpop.f32.mrf.mxu1 }
 0x351   : > { %4413 = vst [vmem:[#allocation35_spill] sm:$0xff] %v3433_v21 }
 0x352   : > { %v3437_v23 = vpop.f32.mrf.mxu1 }
 0x353   : > { %1495 = vmax.xlane.f32.xlu1 %v1494_v22 }
 0x354   : > { %v3439_v24 = vpop.f32.mrf.mxu1 }
 0x356   : > { %v3443_v26 = vpop.f32.mrf.mxu1 }
 0x357   : > { %1492 = vmax.xlane.f32.xlu1 %v1491_v25 }
 0x358   : > { %v3445_v27 = vpop.f32.mrf.mxu1 }
 0x35a   : > { %v3449_v29 = vpop.f32.mrf.mxu1 }
 0x35b   : > { %1522 = vmax.xlane.f32.xlu1 %v1521_v28 }
 0x35c   : > { %v3451_v30 = vpop.f32.mrf.mxu1 }
 0x35e   : > { %v3455_v32 = vpop.f32.mrf.mxu1 }
 0x35f   : > { %1489 = vmax.xlane.f32.xlu1 %v1488_v31 }
 0x360   : > { %v3457_v61 = vpop.f32.mrf.mxu1 }
 0x362   : > { %v3461_v2 = vpop.f32.mrf.mxu1 }
 0x363   : > { %1483 = vmax.xlane.f32.xlu1 %v1482_v1 }
 0x364   : > { %v3463_v5 = vpop.f32.mrf.mxu1 }
 0x366   : > { %v3467_v9 = vpop.f32.mrf.mxu1 }
 0x367   : > { %1477 = vmax.xlane.f32.xlu1 %v1476_v6 }
 0x368   : > { %v3469_v10 = vpop.f32.mrf.mxu1 }
 0x369   : > { %v1554_v33 = vmax.f32 %v3467_v9, %v3469_v10 }
 0x36a   : > { %v3471_v13 = vpop.f32.mrf.mxu1 }
 0x36c   : > { %v3473_v16 = vpop.f32.mrf.mxu1 }
 0x36e   : > { %v3475_v19 = vpop.f32.mrf.mxu1 }
 0x370   : > { %v3477_v22 = vpop.f32.mrf.mxu1 }
 0x371   : > { %v1560_v34 = vmax.f32 %v3475_v19, %v3477_v22 }
 0x372   : > { %v3479_v25 = vpop.f32.mrf.mxu1 }
 0x374   : > { %v3481_v28 = vpop.f32.mrf.mxu1 }
 0x375   : > { %v1563_v40 = vmax.f32 %v3479_v25, %v3481_v28 }
 0x376   : > { %v3483_v31 = vpop.f32.mrf.mxu1 }
 0x378   : > { %v3485_v1 = vpop.f32.mrf.mxu1 }
 0x379   : > { %4414 = vst [vmem:[#allocation36_spill] sm:$0xff] %v3485_v1  ;;  %v1566_v6 = vmax.f32 %v3483_v31, %v3485_v1  ;;  %v1557_v1 = vmax.f32 %v3471_v13, %v3473_v16 }
 0x37a   : > { %v3489_v0 = vpop.f32.mrf.mxu1 }
 0x37b   : > { %1567 = vmax.xlane.f32.xlu1 %v1566_v6  ;;  %v1548_v6 = vmax.f32 %v3455_v32, %v3457_v61 }
 0x37c   : > { %v3491_v36 = vpop.f32.mrf.mxu1 }
 0x37d   : > { %v1569_v35 = vmax.f32 %v3489_v0, %v3491_v36 }
 0x37f   : > { %1561 = vmax.xlane.f32.xlu1 %v1560_v34  ;;  %1570 = vmax.xlane.f32.xlu0 %v1569_v35  ;;  %v1542_v34 = vmax.f32 %v3443_v26, %v3445_v27  ;;  %v1551_v35 = vmax.f32 %v3461_v2, %v3463_v5 }
 0x383   : > { %1555 = vmax.xlane.f32.xlu1 %v1554_v33  ;;  %1564 = vmax.xlane.f32.xlu0 %v1563_v40  ;;  %v1536_v33 = vmax.f32 %v3431_v20, %v3433_v21  ;;  %v1545_v40 = vmax.f32 %v3449_v29, %v3451_v30 }
 0x387   : > { %1549 = vmax.xlane.f32.xlu1 %v1548_v6  ;;  %1558 = vmax.xlane.f32.xlu0 %v1557_v1  ;;  %v1530_v6 = vmax.f32 %v3419_v14, %v3421_v15  ;;  %v1539_v1 = vmax.f32 %v3437_v23, %v3439_v24 }
 0x38b   : > { %1543 = vmax.xlane.f32.xlu1 %v1542_v34  ;;  %1552 = vmax.xlane.f32.xlu0 %v1551_v35  ;;  %v1524_v34 = vmax.f32 %v3405_v7, %v3407_v8  ;;  %v1533_v35 = vmax.f32 %v3425_v17, %v3427_v18 }
 0x38f   : > { %1537 = vmax.xlane.f32.xlu1 %v1536_v33  ;;  %1546 = vmax.xlane.f32.xlu0 %v1545_v40  ;;  %v1527_v33 = vmax.f32 %v3413_v11, %v3415_v12 }
 0x393   : > { %1531 = vmax.xlane.f32.xlu1 %v1530_v6  ;;  %1540 = vmax.xlane.f32.xlu0 %v1539_v1 }
 0x397   : > { %1525 = vmax.xlane.f32.xlu1 %v1524_v34  ;;  %1534 = vmax.xlane.f32.xlu0 %v1533_v35 }
 0x39b   : > { %1528 = vmax.xlane.f32.xlu0 %v1527_v33 }
 0x3c0   : > { %v1517_v40 = vpop.xlane.xlu1 %1516 }
 0x3c1   : > { %v1598_v14 = vsub.f32 %v3383_v59, %v1517_v40  ;;  %v1599_v1 = vsub.f32 %v3385_v60, %v1517_v40 }
 0x3c3   : > { %v1688_v34 = vmul.f32 1.442695, %v1598_v14  ;;  %v1690_v33 = vmul.f32 1.442695, %v1599_v1 }
 0x3c4   : > { %v1514_v21 = vpop.xlane.xlu1 %1513  ;;  %v1520_v11 = vpop.xlane.xlu0 %1519 }
 0x3c5   : > { %v1596_v35 = vsub.f32 %v3379_v57, %v1514_v21  ;;  %v1597_v17 = vsub.f32 %v3381_v58, %v1514_v21  ;;  %v1601_v57 = vsub.f32 %v3391_v63, %v1520_v11 }
 0x3c7   : > { %v1686_v14 = vmul.f32 1.442695, %v1597_v17  ;;  %v1694_v58 = vmul.f32 1.442695, %v1601_v57 }
 0x3c8   : > { %v1511_v15 = vpop.xlane.xlu1 %1510 }
 0x3c9   : > { %v1594_v6 = vsub.f32 %v3375_v55, %v1511_v15  ;;  %v1595_v8 = vsub.f32 %v3377_v56, %v1511_v15  ;;  %v1600_v56 = vsub.f32 %v3389_v62, %v1520_v11 }
 0x3cb   : > { %v1680_v7 = vmul.f32 1.442695, %v1594_v6  ;;  %v1682_v20 = vmul.f32 1.442695, %v1595_v8  ;;  %v1684_v8 = vmul.f32 1.442695, %v1596_v35 }
 0x3cc   : > { %v1508_v18 = vpop.xlane.xlu1 %1507  ;;  %v1692_v15 = vmul.f32 1.442695, %v1600_v56 }
 0x3cd   : > { %v1592_v12 = vsub.f32 %v3371_v53, %v1508_v18  ;;  %v1593_v59 = vsub.f32 %v3373_v54, %v1508_v18  ;;  %2589 = vpow2.f32 %v1680_v7 }
 0x3ce   : > { %2591 = vpow2.f32 %v1682_v20 }
 0x3cf   : > { %v1676_v55 = vmul.f32 1.442695, %v1592_v12  ;;  %v1678_v60 = vmul.f32 1.442695, %v1593_v59  ;;  %2593 = vpow2.f32 %v1688_v34 }
 0x3d0   : > { %v1505_v40 = vpop.xlane.xlu1 %1504  ;;  %2595 = vpow2.f32 %v1690_v33 }
 0x3d1   : > { %2597 = vpow2.f32 %v1676_v55  ;;  %v1590_v33 = vsub.f32 %v3367_v51, %v1505_v40 }
 0x3d2   : > { %2599 = vpow2.f32 %v1678_v60 }
 0x3d3   : > { %2601 = vpow2.f32 %v1684_v8  ;;  %v1591_v8 = vsub.f32 %v3369_v52, %v1505_v40  ;;  %v1672_v57 = vmul.f32 1.442695, %v1590_v33 }
 0x3d4   : > { %v1502_v53 = vpop.xlane.xlu1 %1501  ;;  %2603 = vpow2.f32 %v1686_v14 }
 0x3d5   : > { %v1588_v54 = vsub.f32 %v3363_v49, %v1502_v53  ;;  %v1589_v7 = vsub.f32 %v3365_v50, %v1502_v53  ;;  %2605 = vpow2.f32 %v1692_v15  ;;  %v1674_v52 = vmul.f32 1.442695, %v1591_v8 }
 0x3d6   : > { %2607 = vpow2.f32 %v1694_v58 }
 0x3d7   : > { %v1668_v18 = vmul.f32 1.442695, %v1588_v54  ;;  %v1670_v62 = vmul.f32 1.442695, %v1589_v7 }
 0x3d8   : > { %v1499_v12 = vpop.xlane.xlu1 %1498 }
 0x3d9   : > { %2609 = vpow2.f32 %v1668_v18  ;;  %v1586_v7 = vsub.f32 %v3359_v47, %v1499_v12  ;;  %v1587_v40 = vsub.f32 %v3361_v48, %v1499_v12 }
 0x3da   : > { %v3535_v20 = vpop.eup %2589  ;;  %2611 = vpow2.f32 %v1670_v62 }
 0x3db   : > { %v3537_v11 = vpop.eup %2591  ;;  %v1666_v33 = vmul.f32 1.442695, %v1587_v40 }
 0x3dc   : > { %v1496_v63 = vpop.xlane.xlu1 %1495  ;;  %v3541_v49 = vpop.eup %2593  ;;  %v1797_v50 = vadd.f32 %v3537_v11, %v3535_v20 }
 0x3dd   : > { %v1584_v17 = vsub.f32 %v3355_v45, %v1496_v63  ;;  %v1585_v21 = vsub.f32 %v3357_v46, %v1496_v63  ;;  %v3545_v6 = vpop.eup %2595 }
 0x3de   : > { %v3547_v35 = vpop.eup %2597  ;;  %1798 = vadd.xlane.f32.xlu0 %v1797_v50  ;;  %v1803_v46 = vadd.f32 %v3545_v6, %v3541_v49 }
 0x3df   : > { %v1660_v1 = vmul.f32 1.442695, %v1584_v17  ;;  %v1662_v34 = vmul.f32 1.442695, %v1585_v21  ;;  %v3550_v55 = vpop.eup %2599  ;;  %v1487_v21 = vpop.xlane.xlu0 %1486 }
 0x3e0   : > { %v1493_v59 = vpop.xlane.xlu1 %1492  ;;  %v3552_v45 = vpop.eup %2601  ;;  %v1794_v60 = vadd.f32 %v3550_v55, %v3547_v35 }
 0x3e1   : > { %2613 = vpow2.f32 %v1660_v1  ;;  %v3558_v56 = vpop.eup %2603  ;;  %v1664_v1 = vmul.f32 1.442695, %v1586_v7 }
 0x3e2   : > { %2615 = vpow2.f32 %v1662_v34  ;;  %1804 = vadd.xlane.f32.xlu0 %v1803_v46  ;;  %1795 = vadd.xlane.f32.xlu1 %v1794_v60  ;;  %v3563_v15 = vpop.eup %2605  ;;  %v1800_v54 = vadd.f32 %v3558_v56, %v3552_v45  ;;  %v1582_v34 = vsub.f32 %v3351_v43, %v1493_v59 }
 0x3e3   : > { %v3567_v58 = vpop.eup %2607  ;;  %2617 = vpow2.f32 %v1672_v57  ;;  %v1578_v57 = vsub.f32 %v3343_v39, %v1487_v21  ;;  %v1481_v7 = vpop.xlane.xlu0 %1480 }
 0x3e4   : > { %v1523_v51 = vpop.xlane.xlu1 %1522  ;;  %v1806_v47 = vadd.f32 %v3567_v58, %v3563_v15 }
 0x3e5   : > { %v1602_v14 = vsub.f32 %v3397_v3, %v1523_v51  ;;  %v1603_v53 = vsub.f32 %v3399_v4, %v1523_v51 }
 0x3e6   : > { %1801 = vadd.xlane.f32.xlu1 %v1800_v54  ;;  %v3573_v17 = vpop.eup %2609 }
 0x3e7   : > { %v1696_v18 = vmul.f32 1.442695, %v1602_v14  ;;  %v1698_v62 = vmul.f32 1.442695, %v1603_v53  ;;  %v3577_v50 = vpop.eup %2611  ;;  %v1656_v14 = vmul.f32 1.442695, %v1582_v34 }
 0x3e8   : > { %v1490_v63 = vpop.xlane.xlu1 %1489  ;;  %v1788_v43 = vadd.f32 %v3577_v50, %v3573_v17  ;;  %v4415_v53 = vld [vmem:[#allocation25_spill] sm:$0xff]  ;;  %v4419_v34 = vld [vmem:[#allocation24_spill] sm:$0xff] }
 0x3e9   : > { %2619 = vpow2.f32 %v1696_v18  ;;  %v1580_v3 = vsub.f32 %v3347_v41, %v1490_v63  ;;  %v1581_v4 = vsub.f32 %v3349_v42, %v1490_v63  ;;  %v1583_v41 = vsub.f32 %v3353_v44, %v1493_v59  ;;  %v4416_v18 = vld [vmem:[#allocation21_spill] sm:$0xff] }
 0x3ea   : > { %2621 = vpow2.f32 %v1698_v62  ;;  %1807 = vadd.xlane.f32.xlu1 %v1806_v47  ;;  %v1579_v54 = vsub.f32 %v4415_v53, %v1487_v21  ;;  %v1648_v63 = vmul.f32 1.442695, %v1578_v57 }
 0x3eb   : > { %v1652_v48 = vmul.f32 1.442695, %v1580_v3  ;;  %v1654_v12 = vmul.f32 1.442695, %v1581_v4  ;;  %2623 = vpow2.f32 %v1674_v52  ;;  %v4417_v52 = vld [vmem:[#allocation22_spill] sm:$0xff]  ;;  %v4418_v3 = vld [vmem:[#allocation23_spill] sm:$0xff] }
 0x3ec   : > { %v1484_v42 = vpop.xlane.xlu1 %1483  ;;  %v1574_v4 = vsub.f32 %v4418_v3, %v1481_v7 }
 0x3ed   : > { %2625 = vpow2.f32 %v1652_v48  ;;  %v1576_v46 = vsub.f32 %v3339_v37, %v1484_v42  ;;  %v1577_v60 = vsub.f32 %v3341_v38, %v1484_v42  ;;  %v1658_v37 = vmul.f32 1.442695, %v1583_v41 }
 0x3ee   : > { %v3583_v8 = vpop.eup %2613  ;;  %2627 = vpow2.f32 %v1654_v12  ;;  %1789 = vadd.xlane.f32.xlu1 %v1788_v43  ;;  %v1575_v48 = vsub.f32 %v4419_v34, %v1481_v7  ;;  %v1640_v42 = vmul.f32 1.442695, %v1574_v4 }
 0x3ef   : > { %v3588_v51 = vpop.eup %2615  ;;  %2629 = vpow2.f32 %v1664_v1  ;;  %v1644_v44 = vmul.f32 1.442695, %v1576_v46  ;;  %v1646_v59 = vmul.f32 1.442695, %v1577_v60  ;;  %v1650_v1 = vmul.f32 1.442695, %v1579_v54 }
 0x3f0   : > { %2631 = vpow2.f32 %v1666_v33  ;;  %v1478_v38 = vpop.xlane.xlu1 %1477  ;;  %v1782_v39 = vadd.f32 %v3588_v51, %v3583_v8  ;;  %v3597_v12 = vpop.eup %2617  ;;  %v1642_v46 = vmul.f32 1.442695, %v1575_v48 }
 0x3f1   : > { %2633 = vpow2.f32 %v1644_v44  ;;  %v1572_v62 = vsub.f32 %v4416_v18, %v1478_v38  ;;  %v1573_v40 = vsub.f32 %v4417_v52, %v1478_v38 }
 0x3f2   : > { %2635 = vpow2.f32 %v1646_v59  ;;  %1783 = vadd.xlane.f32.xlu1 %v1782_v39 }
 0x3f3   : > { %2637 = vpow2.f32 %v1656_v14  ;;  %v1636_v47 = vmul.f32 1.442695, %v1572_v62  ;;  %v1638_v21 = vmul.f32 1.442695, %v1573_v40 }
 0x3f4   : > { %2639 = vpow2.f32 %v1658_v37 }
 0x3f5   : > { %2641 = vpow2.f32 %v1636_v47 }
 0x3f6   : > { %v3599_v33 = vpop.eup %2619  ;;  %2643 = vpow2.f32 %v1638_v21 }
 0x3f7   : > { %v3601_v41 = vpop.eup %2621  ;;  %2645 = vpow2.f32 %v1648_v63 }
 0x3f8   : > { %2647 = vpow2.f32 %v1650_v1  ;;  %v1809_v60 = vadd.f32 %v3601_v41, %v3599_v33  ;;  %v3605_v57 = vpop.eup %2623 }
 0x3f9   : > { %2649 = vpow2.f32 %v1640_v42  ;;  %v1791_v59 = vadd.f32 %v3605_v57, %v3597_v12 }
 0x3fa   : > { %v3607_v43 = vpop.eup %2625  ;;  %1810 = vadd.xlane.f32.xlu0 %v1809_v60  ;;  %2651 = vpow2.f32 %v1642_v46 }
 0x3fb   : > { %v3609_v14 = vpop.eup %2627 }
 0x3fc   : > { %v3611_v44 = vpop.eup %2629  ;;  %v1776_v53 = vadd.f32 %v3609_v14, %v3607_v43 }
 0x3fd   : > { %v3617_v54 = vpop.eup %2631 }
 0x3fe   : > { %v3619_v7 = vpop.eup %2633  ;;  %1792 = vadd.xlane.f32.xlu0 %v1791_v59  ;;  %1777 = vadd.xlane.f32.xlu1 %v1776_v53  ;;  %v1785_v39 = vadd.f32 %v3617_v54, %v3611_v44 }
 0x3ff   : > { %v3621_v37 = vpop.eup %2635 }
 0x400   : > { %v3623_v38 = vpop.eup %2637  ;;  %v1770_v18 = vadd.f32 %v3621_v37, %v3619_v7 }
 0x401   : > { %4420 = vst [vmem:[#allocation25_spill] sm:$0xff] %v3623_v38  ;;  %v3629_v62 = vpop.eup %2639 }
 0x402   : > { %v3631_v52 = vpop.eup %2641  ;;  %1786 = vadd.xlane.f32.xlu0 %v1785_v39  ;;  %1771 = vadd.xlane.f32.xlu1 %v1770_v18  ;;  %v1779_v4 = vadd.f32 %v3629_v62, %v3623_v38 }
 0x403   : > { %4421 = vst [vmem:[#allocation21_spill] sm:$0xff] %v3631_v52  ;;  %v3633_v40 = vpop.eup %2643 }
 0x404   : > { %4422 = vst [vmem:[#allocation22_spill] sm:$0xff] %v3633_v40  ;;  %v3635_v63 = vpop.eup %2645  ;;  %v1568_v3 = vpop.xlane.xlu1 %1567  ;;  %v1764_v47 = vadd.f32 %v3633_v40, %v3631_v52 }
 0x405   : > { %4423 = vst [vmem:[#allocation23_spill] sm:$0xff] %v3635_v63  ;;  %v3641_v21 = vpop.eup %2647  ;;  %v1632_v38 = vsub.f32 %v3483_v31, %v1568_v3 }
 0x406   : > { %4424 = vst [vmem:[#allocation24_spill] sm:$0xff] %v3641_v21  ;;  %1780 = vadd.xlane.f32.xlu0 %v1779_v4  ;;  %1765 = vadd.xlane.f32.xlu1 %v1764_v47  ;;  %v3643_v1 = vpop.eup %2649  ;;  %v1773_v42 = vadd.f32 %v3641_v21, %v3635_v63 }
 0x407   : > { %4425 = vst [vmem:[#allocation37_spill] sm:$0xff] %v3643_v1  ;;  %v3647_v46 = vpop.eup %2651 }
 0x408   : > { %v1571_v34 = vpop.xlane.xlu0 %1570  ;;  %v1562_v48 = vpop.xlane.xlu1 %1561  ;;  %v1767_v18 = vadd.f32 %v3647_v46, %v3643_v1 }
 0x409   : > { %v1628_v60 = vsub.f32 %v3475_v19, %v1562_v48  ;;  %v1629_v59 = vsub.f32 %v3477_v22, %v1562_v48 }
 0x40a   : > { %1774 = vadd.xlane.f32.xlu0 %v1773_v42 }
 0x40b   : > { %v1748_v4 = vmul.f32 1.442695, %v1628_v60  ;;  %v1750_v52 = vmul.f32 1.442695, %v1629_v59  ;;  %v4426_v59 = vld [vmem:[#allocation36_spill] sm:$0xff] }
 0x40c   : > { %v1565_v53 = vpop.xlane.xlu0 %1564  ;;  %v1556_v39 = vpop.xlane.xlu1 %1555  ;;  %v1633_v1 = vsub.f32 %v4426_v59, %v1568_v3 }
 0x40d   : > { %v1624_v47 = vsub.f32 %v3467_v9, %v1556_v39  ;;  %v1625_v40 = vsub.f32 %v3469_v10, %v1556_v39  ;;  %v1630_v63 = vsub.f32 %v3479_v25, %v1565_v53  ;;  %v1631_v19 = vsub.f32 %v3481_v28, %v1565_v53  ;;  %v563_v25 = vld [vmem:[%s493_s14] sm:$0xff] }
 0x40e   : > { %1768 = vadd.xlane.f32.xlu0 %v1767_v18  ;;  %2653 = vpow2.f32 %v1748_v4  ;;  %v1634_v10 = vsub.f32 %v3489_v0, %v1571_v34  ;;  %v1635_v53 = vsub.f32 %v3491_v36, %v1571_v34  ;;  %v952_v4 = vcombine.high %v563_v25, %v563_v25 }
 0x40f   : > { %v1740_v21 = vmul.f32 1.442695, %v1624_v47  ;;  %v1742_v22 = vmul.f32 1.442695, %v1625_v40  ;;  %2655 = vpow2.f32 %v1750_v52  ;;  %v1752_v39 = vmul.f32 1.442695, %v1630_v63 }
 0x410   : > { %v1559_v48 = vpop.xlane.xlu0 %1558  ;;  %v1550_v42 = vpop.xlane.xlu1 %1549  ;;  %v1754_v18 = vmul.f32 1.442695, %v1631_v19  ;;  %v1758_v3 = vmul.f32 1.442695, %v1633_v1  ;;  %2465 = vmatprep.subr.msk.mxu0 %vm636_vm0, %v952_v4  ;;  %v1760_v63 = vmul.f32 1.442695, %v1634_v10 }
 0x411   : > { %v1626_v60 = vsub.f32 %v3471_v13, %v1559_v48  ;;  %v1627_v9 = vsub.f32 %v3473_v16, %v1559_v48  ;;  %2657 = vpow2.f32 %v1740_v21  ;;  %v1756_v13 = vmul.f32 1.442695, %v1632_v38  ;;  %2466 = vmatpush1.msk.msra.mxu0 %vm636_vm0, %v563_v25 }
 0x412   : > { %2659 = vpow2.f32 %v1742_v22  ;;  %v1620_v16 = vsub.f32 %v3455_v32, %v1550_v42  ;;  %v1621_v0 = vsub.f32 %v3457_v61, %v1550_v42  ;;  %v1762_v36 = vmul.f32 1.442695, %v1635_v53 }
 0x413   : > { %v1744_v28 = vmul.f32 1.442695, %v1626_v60  ;;  %v1746_v40 = vmul.f32 1.442695, %v1627_v9 }
 0x414   : > { %v1553_v31 = vpop.xlane.xlu0 %1552  ;;  %v1544_v52 = vpop.xlane.xlu1 %1543  ;;  %v1732_v32 = vmul.f32 1.442695, %v1620_v16  ;;  %v1734_v61 = vmul.f32 1.442695, %v1621_v0 }
 0x415   : > { %2661 = vpow2.f32 %v1744_v28  ;;  %v1622_v21 = vsub.f32 %v3461_v2, %v1553_v31  ;;  %v1623_v38 = vsub.f32 %v3463_v5, %v1553_v31  ;;  %v1616_v1 = vsub.f32 %v3443_v26, %v1544_v52 }
 0x416   : > { %2663 = vpow2.f32 %v1746_v40  ;;  %v1617_v47 = vsub.f32 %v3445_v27, %v1544_v52 }
 0x417   : > { %2665 = vpow2.f32 %v1752_v39  ;;  %v1736_v19 = vmul.f32 1.442695, %v1622_v21  ;;  %v1738_v2 = vmul.f32 1.442695, %v1623_v38  ;;  %v1724_v5 = vmul.f32 1.442695, %v1616_v1 }
 0x418   : > { %2667 = vpow2.f32 %v1754_v18  ;;  %v1547_v34 = vpop.xlane.xlu0 %1546  ;;  %v1726_v9 = vmul.f32 1.442695, %v1617_v47  ;;  %v1538_v25 = vpop.xlane.xlu1 %1537 }
 0x419   : > { %2669 = vpow2.f32 %v1756_v13  ;;  %v1618_v22 = vsub.f32 %v3449_v29, %v1547_v34  ;;  %v1619_v48 = vsub.f32 %v3451_v30, %v1547_v34  ;;  %v4428_v13 = vld [vmem:[#allocation35_spill] sm:$0xff]  ;;  %v4429_v34 = vld [vmem:[#allocation32_spill] sm:$0xff] }
 0x41a   : > { %2671 = vpow2.f32 %v1758_v3 }
 0x41b   : > { %2673 = vpow2.f32 %v1760_v63  ;;  %v3674_v60 = vpop.eup %2653  ;;  %v1728_v59 = vmul.f32 1.442695, %v1618_v22  ;;  %v1730_v29 = vmul.f32 1.442695, %v1619_v48 }
 0x41c   : > { %2675 = vpow2.f32 %v1762_v36  ;;  %v1541_v42 = vpop.xlane.xlu0 %1540  ;;  %v3676_v26 = vpop.eup %2655 }
 0x41d   : > { %2677 = vpow2.f32 %v1732_v32  ;;  %v1614_v27 = vsub.f32 %v3437_v23, %v1541_v42  ;;  %v1615_v30 = vsub.f32 %v3439_v24, %v1541_v42  ;;  %v4427_v23 = vld [vmem:[#allocation34_spill] sm:$0xff]  ;;  %v1613_v24 = vsub.f32 %v4428_v13, %v1538_v25  ;;  %v1532_v47 = vpop.xlane.xlu1 %1531 }
 0x41e   : > { %2679 = vpow2.f32 %v1734_v61  ;;  %v3679_v10 = vpop.eup %2657  ;;  %v1612_v18 = vsub.f32 %v4427_v23, %v1538_v25  ;;  %v1848_v21 = vadd.f32 %v3676_v26, %v3674_v60 }
 0x41f   : > { %2681 = vpow2.f32 %v1736_v19  ;;  %v3682_v39 = vpop.eup %2659  ;;  %v1720_v31 = vmul.f32 1.442695, %v1614_v27  ;;  %v1722_v16 = vmul.f32 1.442695, %v1615_v30  ;;  %v1718_v61 = vmul.f32 1.442695, %v1613_v24 }
 0x420   : > { %2683 = vpow2.f32 %v1738_v2  ;;  %v1842_v40 = vadd.f32 %v3682_v39, %v3679_v10  ;;  %v1535_v3 = vpop.xlane.xlu0 %1534  ;;  %v1716_v38 = vmul.f32 1.442695, %v1612_v18  ;;  %v4430_v19 = vld [vmem:[#allocation33_spill] sm:$0xff]  ;;  %v4432_v30 = vld [vmem:[#allocation31_spill] sm:$0xff] }
 0x421   : > { %2685 = vpow2.f32 %v1724_v5  ;;  %v1610_v32 = vsub.f32 %v4429_v34, %v1535_v3  ;;  %v1611_v22 = vsub.f32 %v4430_v19, %v1535_v3 }
 0x422   : > { %v3684_v28 = vpop.eup %2661  ;;  %2687 = vpow2.f32 %v1726_v9  ;;  %1843 = vadd.xlane.f32.xlu1 %v1842_v40  ;;  %v1609_v40 = vsub.f32 %v4432_v30, %v1532_v47 }
 0x423   : > { %v3688_v53 = vpop.eup %2663  ;;  %2689 = vpow2.f32 %v1728_v59  ;;  %v4431_v59 = vld [vmem:[#allocation30_spill] sm:$0xff]  ;;  %v1714_v23 = vmul.f32 1.442695, %v1611_v22 }
 0x424   : > { %v3691_v4 = vpop.eup %2665  ;;  %2691 = vpow2.f32 %v1730_v29  ;;  %v1845_v0 = vadd.f32 %v3688_v53, %v3684_v28  ;;  %v1608_v27 = vsub.f32 %v4431_v59, %v1532_v47  ;;  %v1712_v29 = vmul.f32 1.442695, %v1610_v32  ;;  %v1529_v18 = vpop.xlane.xlu0 %1528  ;;  %v4434_v47 = vld [vmem:[#allocation29_spill] sm:$0xff]  ;;  %v4435_v59 = vld [vmem:[#allocation26_spill] sm:$0xff] }
 0x425   : > { %v3696_v52 = vpop.eup %2667  ;;  %2693 = vpow2.f32 %v1720_v31  ;;  %v1710_v32 = vmul.f32 1.442695, %v1609_v40  ;;  %v1607_v19 = vsub.f32 %v4434_v47, %v1529_v18  ;;  %v4436_v40 = vld [vmem:[#allocation27_spill] sm:$0xff] }
 0x426   : > { %v3698_v63 = vpop.eup %2669  ;;  %1846 = vadd.xlane.f32.xlu0 %v1845_v0  ;;  %2695 = vpow2.f32 %v1722_v16  ;;  %1849 = vadd.xlane.f32.xlu1 %v1848_v21  ;;  %v1851_v2 = vadd.f32 %v3696_v52, %v3691_v4  ;;  %v1708_v0 = vmul.f32 1.442695, %v1608_v27  ;;  %v4433_v21 = vld [vmem:[#allocation28_spill] sm:$0xff] }
 0x427   : > { %v3702_v36 = vpop.eup %2671  ;;  %2697 = vpow2.f32 %v1716_v38  ;;  %v1606_v38 = vsub.f32 %v4433_v21, %v1529_v18  ;;  %v1706_v18 = vmul.f32 1.442695, %v1607_v19 }
 0x428   : > { %v3705_v1 = vpop.eup %2673  ;;  %v1854_v5 = vadd.f32 %v3702_v36, %v3698_v63  ;;  %2699 = vpow2.f32 %v1718_v61  ;;  %v1526_v61 = vpop.xlane.xlu1 %1525 }
 0x429   : > { %v3710_v48 = vpop.eup %2675  ;;  %2701 = vpow2.f32 %v1712_v29  ;;  %v1604_v27 = vsub.f32 %v4435_v59, %v1526_v61  ;;  %v1704_v29 = vmul.f32 1.442695, %v1606_v38 }
 0x42a   : > { %v3712_v42 = vpop.eup %2677  ;;  %1852 = vadd.xlane.f32.xlu0 %v1851_v2  ;;  %1855 = vadd.xlane.f32.xlu1 %v1854_v5  ;;  %v1857_v31 = vadd.f32 %v3710_v48, %v3705_v1  ;;  %2703 = vpow2.f32 %v1714_v23  ;;  %v1605_v23 = vsub.f32 %v4436_v40, %v1526_v61 }
 0x42b   : > { %v3716_v9 = vpop.eup %2679  ;;  %2705 = vpow2.f32 %v1708_v0  ;;  %v1700_v21 = vmul.f32 1.442695, %v1604_v27 }
 0x42c   : > { %v3719_v25 = vpop.eup %2681  ;;  %v1836_v16 = vadd.f32 %v3716_v9, %v3712_v42  ;;  %2707 = vpow2.f32 %v1710_v32  ;;  %v1702_v0 = vmul.f32 1.442695, %v1605_v23 }
 0x42d   : > { %v3724_v13 = vpop.eup %2683  ;;  %2709 = vpow2.f32 %v1704_v29 }
 0x42e   : > { %v3726_v24 = vpop.eup %2685  ;;  %1858 = vadd.xlane.f32.xlu0 %v1857_v31  ;;  %1837 = vadd.xlane.f32.xlu1 %v1836_v16  ;;  %v1839_v22 = vadd.f32 %v3724_v13, %v3719_v25  ;;  %2711 = vpow2.f32 %v1706_v18 }
 0x42f   : > { %v3730_v3 = vpop.eup %2687  ;;  %2713 = vpow2.f32 %v1700_v21 }
 0x430   : > { %v3733_v34 = vpop.eup %2689  ;;  %v1830_v5 = vadd.f32 %v3730_v3, %v3726_v24  ;;  %2715 = vpow2.f32 %v1702_v0 }
 0x431   : > { %v3738_v2 = vpop.eup %2691 }
 0x432   : > { %1840 = vadd.xlane.f32.xlu0 %v1839_v22  ;;  %v3743_v30 = vpop.eup %2693  ;;  %1831 = vadd.xlane.f32.xlu1 %v1830_v5  ;;  %v1833_v31 = vadd.f32 %v3738_v2, %v3733_v34 }
 0x433   : > { %v3748_v16 = vpop.eup %2695 }
 0x434   : > { %v3750_v47 = vpop.eup %2697  ;;  %v1827_v38 = vadd.f32 %v3748_v16, %v3743_v30 }
 0x435   : > { %v3754_v32 = vpop.eup %2699 }
 0x436   : > { %1834 = vadd.xlane.f32.xlu0 %v1833_v31  ;;  %v3756_v61 = vpop.eup %2701  ;;  %v1824_v19 = vadd.f32 %v3754_v32, %v3750_v47 }
 0x437   : > { %v3760_v22 = vpop.eup %2703 }
 0x438   : > { %v3762_v5 = vpop.eup %2705  ;;  %v1821_v59 = vadd.f32 %v3760_v22, %v3756_v61 }
 0x439   : > { %v3766_v27 = vpop.eup %2707 }
 0x43a   : > { %1828 = vadd.xlane.f32.xlu0 %v1827_v38  ;;  %v3768_v29 = vpop.eup %2709  ;;  %v1818_v40 = vadd.f32 %v3766_v27, %v3762_v5  ;;  %v898_v38 = vld [vmem:[%s4323_s9 + $0x18] sm:$0xff] }
 0x43b   : > { %v3772_v23 = vpop.eup %2711 }
 0x43c   : > { %v3774_v18 = vpop.eup %2713  ;;  %v1815_v31 = vadd.f32 %v3772_v23, %v3768_v29 }
 0x43d   : > { %4437 = vst [vmem:[#allocation36_spill] sm:$0xff] %v3774_v18  ;;  %v3778_v21 = vpop.eup %2715 }
 0x43e   : > { %1825 = vadd.xlane.f32.xlu0 %v1824_v19  ;;  %4438 = vst [vmem:[#allocation34_spill] sm:$0xff] %v3778_v21  ;;  %v1812_v0 = vadd.f32 %v3778_v21, %v3774_v18  ;;  %v894_v19 = vld [vmem:[%s4322_s8] sm:$0xf] }
 0x43f   : > { %v895_v18 = vld [vmem:[%s4323_s9] sm:$0xff] }
 0x442   : > { %1822 = vadd.xlane.f32.xlu0 %v1821_v59  ;;  %v897_v59 = vld [vmem:[%s4323_s9 + $0x10] sm:$0xff] }
 0x446   : > { %1819 = vadd.xlane.f32.xlu0 %v1818_v40 }
 0x44a   : > { %1816 = vadd.xlane.f32.xlu0 %v1815_v31  ;;  %v896_v31 = vld [vmem:[%s4323_s9 + $0x8] sm:$0xff] }
 0x44e   : > { %1813 = vadd.xlane.f32.xlu0 %v1812_v0 }
 0x464   : > { %916 = vperm.xlu0 %2585, %v898_v38  }
 0x465   : > { %919 = vxpose.xlu1.b32.start.end [1/1] (short) (narrow) %v894_v19, 32  ;;  %v2118_v19 = vld [vmem:[%s4439_s19 + $0x8] sm:$0xff] }
 0x467   : > { %v1799_v40 = vpop.xlane.xlu0 %1798 }
 0x468   : > { %911 = vperm.xlu0 %2585, %v897_v59   ;;  %2717 = vrcp.f32 %v1799_v40  ;;  %v2119_v40 = vld [vmem:[%s4439_s19 + $0x10] sm:$0xff] }
 0x46b   : > { %v1805_v0 = vpop.xlane.xlu0 %1804  ;;  %v1796_v38 = vpop.xlane.xlu1 %1795 }
 0x46c   : > { %906 = vperm.xlu0 %2585, %v896_v31   ;;  %2719 = vrcp.f32 %v1805_v0 }
 0x46d   : > { %2721 = vrcp.f32 %v1796_v38 }
 0x46f   : > { %v1802_v21 = vpop.xlane.xlu1 %1801 }
 0x470   : > { %901 = vperm.xlu0 %2585, %v895_v18   ;;  %2723 = vrcp.f32 %v1802_v21  ;;  %v2120_v21 = vld [vmem:[%s4439_s19 + $0x18] sm:$0xff] }
 0x473   : > { %v1808_v59 = vpop.xlane.xlu1 %1807 }
 0x474   : > { %2128 = vperm.xlu0 %2585, %v2118_v19   ;;  %2725 = vrcp.f32 %v1808_v59 }
 0x475   : > { %v2718_v31 = vpop.eup %2717 }
 0x476   : > { %v3805_v0 = vmul.f32 %v2718_v31, %v3537_v11  ;;  %v3808_v18 = vmul.f32 %v2718_v31, %v3535_v20 }
 0x477   : > { %v1790_v38 = vpop.xlane.xlu1 %1789 }
 0x478   : > { %2133 = vperm.xlu0 %2585, %v2119_v40   ;;  %2727 = vrcp.f32 %v1790_v38  ;;  %1979 = vst [vmem:[%s3813_s20 + $0xb8] sm:$0xff] %v3805_v0  ;;  %1978 = vst [vmem:[%s3813_s20 + $0xb0] sm:$0xff] %v3808_v18 }
 0x479   : > { %v2720_v20 = vpop.eup %2719 }
 0x47a   : > { %v2722_v11 = vpop.eup %2721  ;;  %v3820_v19 = vmul.f32 %v2720_v20, %v3545_v6  ;;  %v3823_v59 = vmul.f32 %v2720_v20, %v3541_v49 }
 0x47b   : > { %v1784_v40 = vpop.xlane.xlu1 %1783  ;;  %v3826_v31 = vmul.f32 %v2722_v11, %v3550_v55  ;;  %v3829_v38 = vmul.f32 %v2722_v11, %v3547_v35 }
 0x47c   : > { %2138 = vperm.xlu0 %2585, %v2120_v21   ;;  %2729 = vrcp.f32 %v1784_v40  ;;  %1983 = vst [vmem:[%s3813_s20 + $0xd8] sm:$0xff] %v3820_v19  ;;  %1982 = vst [vmem:[%s3813_s20 + $0xd0] sm:$0xff] %v3823_v59 }
 0x47d   : > { %4440 = vst [vmem:[#allocation35_spill] sm:$0xff] %v3829_v38  ;;  %v2724_v21 = vpop.eup %2723  ;;  %1977 = vst [vmem:[%s3813_s20 + $0xa8] sm:$0xff] %v3826_v31 }
 0x47e   : > { %1976 = vst [vmem:[%s3813_s20 + $0xa0] sm:$0xff] %v3829_v38  ;;  %v3840_v49 = vmul.f32 %v2724_v21, %v3558_v56  ;;  %v3843_v6 = vmul.f32 %v2724_v21, %v3552_v45 }
 0x480   : > { %1981 = vst [vmem:[%s3813_s20 + $0xc8] sm:$0xff] %v3840_v49  ;;  %1980 = vst [vmem:[%s3813_s20 + $0xc0] sm:$0xff] %v3843_v6 }
 0x481   : > { %v2726_v35 = vpop.eup %2725 }
 0x482   : > { %v3850_v20 = vmul.f32 %v2726_v35, %v3567_v58  ;;  %v3853_v11 = vmul.f32 %v2726_v35, %v3563_v15 }
 0x483   : > { %v1811_v55 = vpop.xlane.xlu0 %1810 }
 0x484   : > { %2731 = vrcp.f32 %v1811_v55  ;;  %1985 = vst [vmem:[%s3813_s20 + $0xe8] sm:$0xff] %v3850_v20  ;;  %1984 = vst [vmem:[%s3813_s20 + $0xe0] sm:$0xff] %v3853_v11 }
 0x485   : > { %v2728_v45 = vpop.eup %2727 }
 0x486   : > { %v3860_v21 = vmul.f32 %v2728_v45, %v3577_v50  ;;  %v3863_v55 = vmul.f32 %v2728_v45, %v3573_v17  ;;  %v2117_v17 = vld [vmem:[%s4439_s19] sm:$0xff] }
 0x487   : > { %v1793_v56 = vpop.xlane.xlu0 %1792  ;;  %v1778_v40 = vpop.xlane.xlu1 %1777 }
 0x488   : > { %2733 = vrcp.f32 %v1793_v56  ;;  %1973 = vst [vmem:[%s3813_s20 + $0x88] sm:$0xff] %v3860_v21  ;;  %1972 = vst [vmem:[%s3813_s20 + $0x80] sm:$0xff] %v3863_v55 }
 0x489   : > { %2735 = vrcp.f32 %v1778_v40  ;;  %v2730_v15 = vpop.eup %2729 }
 0x48a   : > { %v3870_v38 = vmul.f32 %v2730_v15, %v3588_v51  ;;  %v3873_v56 = vmul.f32 %v2730_v15, %v3583_v8 }
 0x48b   : > { %v1787_v58 = vpop.xlane.xlu0 %1786  ;;  %v1772_v35 = vpop.xlane.xlu1 %1771 }
 0x48c   : > { %2737 = vrcp.f32 %v1787_v58  ;;  %1969 = vst [vmem:[%s3813_s20 + $0x68] sm:$0xff] %v3870_v38  ;;  %1968 = vst [vmem:[%s3813_s20 + $0x60] sm:$0xff] %v3873_v56 }
 0x48d   : > { %2739 = vrcp.f32 %v1772_v35 }
 0x48f   : > { %v1781_v50 = vpop.xlane.xlu0 %1780  ;;  %v1766_v45 = vpop.xlane.xlu1 %1765  ;;  %2123 = vperm.xlu1 %2584, %v2117_v17  }
 0x490   : > { %2741 = vrcp.f32 %v1781_v50 }
 0x491   : > { %v2732_v40 = vpop.eup %2731  ;;  %2743 = vrcp.f32 %v1766_v45 }
 0x492   : > { %v1907_v8 = vmul.f32 %v2732_v40, %v3601_v41  ;;  %v3884_v51 = vmul.f32 %v2732_v40, %v3599_v33 }
 0x493   : > { %v1775_v15 = vpop.xlane.xlu0 %1774 }
 0x494   : > { %2745 = vrcp.f32 %v1775_v15  ;;  %1987 = vst [vmem:[%s3813_s20 + $0xf8] sm:$0xff] %v1907_v8  ;;  %2028 = vmatprep.subr.mxu0 %v1907_v8  ;;  %1986 = vst [vmem:[%s3813_s20 + $0xf0] sm:$0xff] %v3884_v51 }
 0x495   : > { %v2734_v58 = vpop.eup %2733 }
 0x496   : > { %v2736_v35 = vpop.eup %2735  ;;  %v3890_v17 = vmul.f32 %v2734_v58, %v3605_v57  ;;  %v3893_v41 = vmul.f32 %v2734_v58, %v3597_v12 }
 0x497   : > { %v1769_v33 = vpop.xlane.xlu0 %1768  ;;  %v3896_v50 = vmul.f32 %v2736_v35, %v3609_v14  ;;  %v3899_v45 = vmul.f32 %v2736_v35, %v3607_v43 }
 0x498   : > { %2747 = vrcp.f32 %v1769_v33  ;;  %1975 = vst [vmem:[%s3813_s20 + $0x98] sm:$0xff] %v3890_v17  ;;  %1974 = vst [vmem:[%s3813_s20 + $0x90] sm:$0xff] %v3893_v41  ;;  %v4446_v33 = vld [vmem:[#allocation21_spill] sm:$0xff] }
 0x499   : > { %v2738_v57 = vpop.eup %2737  ;;  %1965 = vst [vmem:[%s3813_s20 + $0x48] sm:$0xff] %v3896_v50  ;;  %1964 = vst [vmem:[%s3813_s20 + $0x40] sm:$0xff] %v3899_v45 }
 0x49a   : > { %v2740_v12 = vpop.eup %2739  ;;  %v3910_v14 = vmul.f32 %v2738_v57, %v3617_v54  ;;  %v3913_v43 = vmul.f32 %v2738_v57, %v3611_v44 }
 0x49b   : > { %v3916_v40 = vmul.f32 %v2740_v12, %v3621_v37  ;;  %v3919_v8 = vmul.f32 %v2740_v12, %v3619_v7  ;;  %v4443_v37 = vld [vmem:[#allocation25_spill] sm:$0xff]  ;;  %v4444_v7 = vld [vmem:[#allocation22_spill] sm:$0xff] }
 0x49c   : > { %1971 = vst [vmem:[%s3813_s20 + $0x78] sm:$0xff] %v3910_v14  ;;  %1970 = vst [vmem:[%s3813_s20 + $0x70] sm:$0xff] %v3913_v43 }
 0x49d   : > { %4441 = vst [vmem:[#allocation32_spill] sm:$0xff] %v3916_v40  ;;  %4442 = vst [vmem:[#allocation33_spill] sm:$0xff] %v3919_v8  ;;  %v2742_v15 = vpop.eup %2741 }
 0x49e   : > { %1961 = vst [vmem:[%s3813_s20 + $0x28] sm:$0xff] %v3916_v40  ;;  %1960 = vst [vmem:[%s3813_s20 + $0x20] sm:$0xff] %v3919_v8  ;;  %v2744_v44 = vpop.eup %2743  ;;  %v3930_v54 = vmul.f32 %v2742_v15, %v3629_v62  ;;  %v3933_v58 = vmul.f32 %v2742_v15, %v4443_v37  ;;  %v4448_v62 = vld [vmem:[#allocation24_spill] sm:$0xff]  ;;  %v4449_v15 = vld [vmem:[#allocation23_spill] sm:$0xff] }
 0x49f   : > { %v3936_v35 = vmul.f32 %v2744_v44, %v4444_v7  ;;  %v3939_v57 = vmul.f32 %v2744_v44, %v4446_v33  ;;  %v4451_v33 = vld [vmem:[#allocation37_spill] sm:$0xff] }
 0x4a0   : > { %1967 = vst [vmem:[%s3813_s20 + $0x58] sm:$0xff] %v3930_v54  ;;  %1966 = vst [vmem:[%s3813_s20 + $0x50] sm:$0xff] %v3933_v58 }
 0x4a1   : > { %4445 = vst [vmem:[#allocation30_spill] sm:$0xff] %v3936_v35  ;;  %4447 = vst [vmem:[#allocation31_spill] sm:$0xff] %v3939_v57  ;;  %v2746_v12 = vpop.eup %2745 }
 0x4a2   : > { %1957 = vst [vmem:[%s3813_s20 + $0x8] sm:$0xff] %v3936_v35  ;;  %1956 = vst [vmem:[%s3813_s20] sm:$0xff] %v3939_v57  ;;  %v3950_v8 = vmul.f32 %v2746_v12, %v4448_v62  ;;  %v3953_v37 = vmul.f32 %v2746_v12, %v4449_v15 }
 0x4a4   : > { %1963 = vst [vmem:[%s3813_s20 + $0x38] sm:$0xff] %v3950_v8  ;;  %1962 = vst [vmem:[%s3813_s20 + $0x30] sm:$0xff] %v3953_v37 }
 0x4a5   : > { %v2748_v44 = vpop.eup %2747 }
 0x4a6   : > { %v3960_v7 = vmul.f32 %v2748_v44, %v3647_v46  ;;  %v3963_v40 = vmul.f32 %v2748_v44, %v4451_v33 }
 0x4a8   : > { %4450 = vst [vmem:[#allocation28_spill] sm:$0xff] %v3960_v7  ;;  %1959 = vst [vmem:[%s3813_s20 + $0x18] sm:$0xff] %v3960_v7 }
 0x4a9   : > { %1958 = vst [vmem:[%s3813_s20 + $0x10] sm:$0xff] %v3963_v40 }
 0x4ab   : > { %v1844_v62 = vpop.xlane.xlu1 %1843 }
 0x4ac   : > { %2749 = vrcp.f32 %v1844_v62 }
 0x4af   : > { %v1847_v57 = vpop.xlane.xlu0 %1846  ;;  %v1850_v12 = vpop.xlane.xlu1 %1849 }
 0x4b0   : > { %2751 = vrcp.f32 %v1847_v57 }
 0x4b1   : > { %2753 = vrcp.f32 %v1850_v12 }
 0x4b3   : > { %v1853_v15 = vpop.xlane.xlu0 %1852  ;;  %v1856_v35 = vpop.xlane.xlu1 %1855 }
 0x4b4   : > { %2755 = vrcp.f32 %v1853_v15 }
 0x4b5   : > { %2757 = vrcp.f32 %v1856_v35 }
 0x4b7   : > { %v1859_v46 = vpop.xlane.xlu0 %1858  ;;  %v1838_v44 = vpop.xlane.xlu1 %1837 }
 0x4b8   : > { %2759 = vrcp.f32 %v1859_v46 }
 0x4b9   : > { %2761 = vrcp.f32 %v1838_v44  ;;  %v2750_v33 = vpop.eup %2749 }
 0x4ba   : > { %v3970_v62 = vmul.f32 %v2750_v33, %v3682_v39  ;;  %v3973_v57 = vmul.f32 %v2750_v33, %v3679_v10 }
 0x4bb   : > { %v1841_v7 = vpop.xlane.xlu0 %1840  ;;  %v1832_v15 = vpop.xlane.xlu1 %1831 }
 0x4bc   : > { %2763 = vrcp.f32 %v1841_v7  ;;  %2009 = vst [vmem:[%s3813_s20 + $0x1a8] sm:$0xff] %v3970_v62  ;;  %2008 = vst [vmem:[%s3813_s20 + $0x1a0] sm:$0xff] %v3973_v57 }
 0x4bd   : > { %v2752_v12 = vpop.eup %2751  ;;  %2765 = vrcp.f32 %v1832_v15 }
 0x4be   : > { %v3976_v35 = vmul.f32 %v2752_v12, %v3688_v53  ;;  %v3979_v46 = vmul.f32 %v2752_v12, %v3684_v28  ;;  %v2754_v39 = vpop.eup %2753 }
 0x4bf   : > { %v1835_v7 = vpop.xlane.xlu0 %1834  ;;  %v3986_v10 = vmul.f32 %v2754_v39, %v3676_v26  ;;  %v3989_v44 = vmul.f32 %v2754_v39, %v3674_v60 }
 0x4c0   : > { %2767 = vrcp.f32 %v1835_v7  ;;  %2011 = vst [vmem:[%s3813_s20 + $0x1b8] sm:$0xff] %v3976_v35  ;;  %2010 = vst [vmem:[%s3813_s20 + $0x1b0] sm:$0xff] %v3979_v46 }
 0x4c1   : > { %v2756_v28 = vpop.eup %2755  ;;  %2013 = vst [vmem:[%s3813_s20 + $0x1c8] sm:$0xff] %v3986_v10  ;;  %2012 = vst [vmem:[%s3813_s20 + $0x1c0] sm:$0xff] %v3989_v44 }
 0x4c2   : > { %v3996_v53 = vmul.f32 %v2756_v28, %v3696_v52  ;;  %v3999_v33 = vmul.f32 %v2756_v28, %v3691_v4  ;;  %v2758_v60 = vpop.eup %2757 }
 0x4c3   : > { %v1829_v26 = vpop.xlane.xlu0 %1828  ;;  %v4006_v12 = vmul.f32 %v2758_v60, %v3702_v36  ;;  %v4009_v15 = vmul.f32 %v2758_v60, %v3698_v63 }
 0x4c4   : > { %2769 = vrcp.f32 %v1829_v26  ;;  %2015 = vst [vmem:[%s3813_s20 + $0x1d8] sm:$0xff] %v3996_v53  ;;  %2014 = vst [vmem:[%s3813_s20 + $0x1d0] sm:$0xff] %v3999_v33 }
 0x4c5   : > { %v2760_v4 = vpop.eup %2759  ;;  %2017 = vst [vmem:[%s3813_s20 + $0x1e8] sm:$0xff] %v4006_v12  ;;  %2016 = vst [vmem:[%s3813_s20 + $0x1e0] sm:$0xff] %v4009_v15 }
 0x4c6   : > { %v4016_v52 = vmul.f32 %v2760_v4, %v3710_v48  ;;  %v4019_v39 = vmul.f32 %v2760_v4, %v3705_v1  ;;  %v2762_v63 = vpop.eup %2761 }
 0x4c7   : > { %v1826_v36 = vpop.xlane.xlu0 %1825  ;;  %v4030_v7 = vmul.f32 %v2762_v63, %v3716_v9  ;;  %v4033_v48 = vmul.f32 %v2762_v63, %v3712_v42 }
 0x4c8   : > { %2771 = vrcp.f32 %v1826_v36  ;;  %2019 = vst [vmem:[%s3813_s20 + $0x1f8] sm:$0xff] %v4016_v52  ;;  %2018 = vst [vmem:[%s3813_s20 + $0x1f0] sm:$0xff] %v4019_v39 }
 0x4c9   : > { %v2764_v1 = vpop.eup %2763  ;;  %2005 = vst [vmem:[%s3813_s20 + $0x188] sm:$0xff] %v4030_v7  ;;  %2004 = vst [vmem:[%s3813_s20 + $0x180] sm:$0xff] %v4033_v48 }
 0x4ca   : > { %v4036_v28 = vmul.f32 %v2764_v1, %v3724_v13  ;;  %v4039_v60 = vmul.f32 %v2764_v1, %v3719_v25  ;;  %v2766_v9 = vpop.eup %2765 }
 0x4cb   : > { %v1823_v26 = vpop.xlane.xlu0 %1822  ;;  %v4050_v42 = vmul.f32 %v2766_v9, %v3730_v3  ;;  %v4053_v25 = vmul.f32 %v2766_v9, %v3726_v24 }
 0x4cc   : > { %2773 = vrcp.f32 %v1823_v26  ;;  %2007 = vst [vmem:[%s3813_s20 + $0x198] sm:$0xff] %v4036_v28  ;;  %2006 = vst [vmem:[%s3813_s20 + $0x190] sm:$0xff] %v4039_v60 }
 0x4cd   : > { %v2768_v13 = vpop.eup %2767  ;;  %2001 = vst [vmem:[%s3813_s20 + $0x168] sm:$0xff] %v4050_v42  ;;  %2000 = vst [vmem:[%s3813_s20 + $0x160] sm:$0xff] %v4053_v25 }
 0x4ce   : > { %v4056_v4 = vmul.f32 %v2768_v13, %v3738_v2  ;;  %v4059_v63 = vmul.f32 %v2768_v13, %v3733_v34 }
 0x4cf   : > { %v1820_v36 = vpop.xlane.xlu0 %1819 }
 0x4d0   : > { %2775 = vrcp.f32 %v1820_v36  ;;  %2003 = vst [vmem:[%s3813_s20 + $0x178] sm:$0xff] %v4056_v4  ;;  %2002 = vst [vmem:[%s3813_s20 + $0x170] sm:$0xff] %v4059_v63 }
 0x4d1   : > { %v2770_v24 = vpop.eup %2769 }
 0x4d2   : > { %v4070_v3 = vmul.f32 %v2770_v24, %v3748_v16  ;;  %v4073_v34 = vmul.f32 %v2770_v24, %v3743_v30 }
 0x4d3   : > { %v1817_v2 = vpop.xlane.xlu0 %1816 }
 0x4d4   : > { %2777 = vrcp.f32 %v1817_v2  ;;  %1999 = vst [vmem:[%s3813_s20 + $0x158] sm:$0xff] %v4070_v3  ;;  %1998 = vst [vmem:[%s3813_s20 + $0x150] sm:$0xff] %v4073_v34 }
 0x4d5   : > { %v2772_v1 = vpop.eup %2771 }
 0x4d6   : > { %v4080_v9 = vmul.f32 %v2772_v1, %v3754_v32  ;;  %v4083_v16 = vmul.f32 %v2772_v1, %v3750_v47 }
 0x4d7   : > { %v1814_v26 = vpop.xlane.xlu0 %1813 }
 0x4d8   : > { %2779 = vrcp.f32 %v1814_v26  ;;  %1997 = vst [vmem:[%s3813_s20 + $0x148] sm:$0xff] %v4080_v9  ;;  %1996 = vst [vmem:[%s3813_s20 + $0x140] sm:$0xff] %v4083_v16 }
 0x4d9   : > { %v2774_v30 = vpop.eup %2773 }
 0x4da   : > { %v4090_v13 = vmul.f32 %v2774_v30, %v3760_v22  ;;  %v4093_v36 = vmul.f32 %v2774_v30, %v3756_v61 }
 0x4dc   : > { %1995 = vst [vmem:[%s3813_s20 + $0x138] sm:$0xff] %v4090_v13  ;;  %1994 = vst [vmem:[%s3813_s20 + $0x130] sm:$0xff] %v4093_v36 }
 0x4dd   : > { %v2776_v47 = vpop.eup %2775 }
 0x4de   : > { %v4100_v32 = vmul.f32 %v2776_v47, %v3766_v27  ;;  %v4103_v24 = vmul.f32 %v2776_v47, %v3762_v5  ;;  %v4452_v27 = vmov 0.0  }
 0x4e0   : > { %1993 = vst [vmem:[%s3813_s20 + $0x128] sm:$0xff] %v4100_v32  ;;  %1992 = vst [vmem:[%s3813_s20 + $0x120] sm:$0xff] %v4103_v24 }
 0x4e1   : > { %v2778_v22 = vpop.eup %2777  ;;  %v935_v1 = vpop.trf.xlu1 }
 0x4e2   : > { %v4110_v2 = vmul.f32 %v2778_v22, %v3772_v23  ;;  %v4113_v61 = vmul.f32 %v2778_v22, %v3768_v29  ;;  %2467 = vmatmul.mubr.msk.f32.vlgmr.msra.gmra.mxu0 %vm623_vm1, %v935_v1  ;;  %v4453_v23 = vld [vmem:[#allocation34_spill] sm:$0xff]  ;;  %v4454_v29 = vld [vmem:[#allocation36_spill] sm:$0xff] }
 0x4e3   : > { %2029 = vmatpush1.msra.mxu0 %v3884_v51  ;;  %1039 = vmatprep.mubr.f32.mxu0 %v4452_v27  ;;  %v2024_v51 = vld [vmem:[%s4455_s3 + $0x20] sm:$0xff] }
 0x4e4   : > { %1991 = vst [vmem:[%s3813_s20 + $0x118] sm:$0xff] %v4110_v2  ;;  %1990 = vst [vmem:[%s3813_s20 + $0x110] sm:$0xff] %v4113_v61  ;;  %2030 = vmatprep.subr.mxu0 %v3850_v20 }
 0x4e5   : > { %v2780_v5 = vpop.eup %2779  ;;  %2031 = vmatpush1.msra.mxu0 %v3853_v11  ;;  %v936_v47 = vpop.trf.xlu1  ;;  %v2020_v11 = vld [vmem:[%s4455_s3] sm:$0xff] }
 0x4e6   : > { %v4124_v26 = vmul.f32 %v2780_v5, %v4453_v23  ;;  %v4127_v30 = vmul.f32 %v2780_v5, %v4454_v29  ;;  %2032 = vmatprep.subr.mxu0 %v3820_v19  ;;  %2468 = vmatmul.mubr.msk.f32.gmra.mxu0 %vm623_vm1, %v936_v47  ;;  %v2021_v19 = vld [vmem:[%s4455_s3 + $0x8] sm:$0xff] }
 0x4e7   : > { %2033 = vmatpush1.msra.mxu0 %v3823_v59  ;;  %1045 = vmatprep.mubr.f32.mxu0 %v4452_v27  ;;  %v4456_v59 = vld [vmem:[#allocation35_spill] sm:$0xff] }
 0x4e8   : > { %1989 = vst [vmem:[%s3813_s20 + $0x108] sm:$0xff] %v4124_v26  ;;  %1988 = vst [vmem:[%s3813_s20 + $0x100] sm:$0xff] %v4127_v30  ;;  %2034 = vmatprep.subr.mxu0 %v3840_v49  ;;  %s2871_s20 = scalar_lea.vmem %s2870_s16, 16384 }
 0x4e9   : > { %2035 = vmatpush1.msra.mxu0 %v3843_v6  ;;  %v937_v20 = vpop.trf.xlu1  ;;  %v4461_v6 = vld [vmem:[#allocation31_spill] sm:$0xff]  ;;  %p2873_p3 = scmp.lt.s32.totalorder %s2871_s20, %s2865_s23 }
 0x4ea   : > { %2036 = vmatprep.subr.mxu0 %v3805_v0  ;;  %2469 = vmatmul.mubr.msk.f32.gmra.mxu0 %vm623_vm1, %v937_v20  ;;  %v4457_v0 = vld [vmem:[#allocation32_spill] sm:$0xff] }
 0x4eb   : > { %2037 = vmatpush1.msra.mxu0 %v3808_v18  ;;  %1051 = vmatprep.mubr.f32.mxu0 %v4452_v27  ;;  %v4458_v18 = vld [vmem:[#allocation33_spill] sm:$0xff]  ;;  %p2874_p9 = por %p2873_p3, %p2872_p1 }
 0x4ec   : > { %2038 = vmatprep.subr.mxu0 %v3826_v31  ;;  %v4459_v31 = vld [vmem:[#allocation28_spill] sm:$0xff] }
 0x4ed   : > { %2039 = vmatpush1.msra.mxu0 %v4456_v59  ;;  %v938_v49 = vpop.trf.xlu1  ;;  %p2875_p0 = pnand %p2874_p9, %p2868_p10 }
 0x4ee   : > { %2040 = vmatprep.subr.mxu0 %v3890_v17  ;;  %2470 = vmatmul.mubr.msk.f32.gmra.mxu0 %vm623_vm1, %v938_v49  ;;  %v2027_v17 = vld [vmem:[%s4455_s3 + $0x38] sm:$0xff] }
 0x4ef   : > { %2041 = vmatpush1.msra.mxu0 %v3893_v41  ;;  %2092 = vmatprep.mubr.f32.mxu0 %v2021_v19  ;;  %v2026_v41 = vld [vmem:[%s4455_s3 + $0x30] sm:$0xff] }
 0x4f0   : > { %2042 = vmatprep.subr.mxu0 %v3860_v21  ;;  %v2023_v21 = vld [vmem:[%s4455_s3 + $0x18] sm:$0xff] }
 0x4f1   : > { %2043 = vmatpush1.msra.mxu0 %v3863_v55  ;;  %v2022_v55 = vld [vmem:[%s4455_s3 + $0x10] sm:$0xff] }
 0x4f2   : > { %2044 = vmatprep.subr.mxu0 %v3910_v14 }
 0x4f3   : > { %2045 = vmatpush1.msra.mxu0 %v3913_v43  ;;  %v917_v43 = vpop.permute.xlu0 %916 }
 0x4f4   : > { %2046 = vmatprep.subr.mxu0 %v3870_v38  ;;  %v4460_v38 = vld [vmem:[#allocation30_spill] sm:$0xff] }
 0x4f5   : > { %2047 = vmatpush1.msra.mxu0 %v3873_v56  ;;  %v2025_v56 = vld [vmem:[%s4455_s3 + $0x28] sm:$0xff] }
 0x4f6   : > { %2048 = vmatprep.subr.mxu0 %v3930_v54 }
 0x4f7   : > { %2049 = vmatpush1.msra.mxu0 %v3933_v58  ;;  %v912_v58 = vpop.permute.xlu0 %911 }
 0x4f8   : > { %2050 = vmatprep.subr.mxu0 %v3896_v50 }
 0x4f9   : > { %2051 = vmatpush1.msra.mxu0 %v3899_v45 }
 0x4fa   : > { %2052 = vmatprep.subr.mxu0 %v3950_v8 }
 0x4fb   : > { %2053 = vmatpush1.msra.mxu0 %v3953_v37 }
 0x4fc   : > { %2054 = vmatprep.subr.mxu0 %v4457_v0 }
 0x4fd   : > { %2055 = vmatpush1.msra.mxu0 %v4458_v18 }
 0x4fe   : > { %2056 = vmatprep.subr.mxu0 %v4459_v31 }
 0x4ff   : > { %2057 = vmatpush1.msra.mxu0 %v3963_v40 }
 0x500   : > { %2058 = vmatprep.subr.mxu0 %v4460_v38 }
 0x501   : > { %2059 = vmatpush1.msra.mxu0 %v4461_v6 }
 0x502   : > { %2060 = vmatprep.subr.mxu0 %v4016_v52 }
 0x503   : > { %2061 = vmatpush2.msra.mxu0 %v4019_v39 }
 0x504   : > { %2062 = vmatprep.subr.mxu0 %v4006_v12 }
 0x505   : > { %2063 = vmatpush2.msra.mxu0 %v4009_v15 }
 0x506   : > { %2064 = vmatprep.subr.mxu0 %v3996_v53 }
 0x507   : > { %2065 = vmatpush2.msra.mxu0 %v3999_v33 }
 0x508   : > { %2066 = vmatprep.subr.mxu0 %v3986_v10  ;;  %v907_v10 = vpop.permute.xlu0 %906 }
 0x509   : > { %2067 = vmatpush2.msra.mxu0 %v3989_v44 }
 0x50a   : > { %2068 = vmatprep.subr.mxu0 %v3976_v35 }
 0x50b   : > { %2069 = vmatpush2.msra.mxu0 %v3979_v46 }
 0x50c   : > { %2070 = vmatprep.subr.mxu0 %v3970_v62  ;;  %v902_v33 = vpop.permute.xlu0 %901 }
 0x50d   : > { %2071 = vmatpush2.msra.mxu0 %v3973_v57 }
 0x50e   : > { %2072 = vmatprep.subr.mxu0 %v4036_v28 }
 0x50f   : > { %2073 = vmatpush2.msra.mxu0 %v4039_v60 }
 0x510   : > { %2074 = vmatprep.subr.mxu0 %v4030_v7 }
 0x511   : > { %2075 = vmatpush2.msra.mxu0 %v4033_v48 }
 0x512   : > { %2076 = vmatprep.subr.mxu0 %v4056_v4 }
 0x513   : > { %2077 = vmatpush2.msra.mxu0 %v4059_v63 }
 0x514   : > { %2078 = vmatprep.subr.mxu0 %v4050_v42 }
 0x515   : > { %2079 = vmatpush2.msra.mxu0 %v4053_v25 }
 0x516   : > { %2080 = vmatprep.subr.mxu0 %v4070_v3 }
 0x517   : > { %2081 = vmatpush2.msra.mxu0 %v4073_v34 }
 0x518   : > { %2082 = vmatprep.subr.mxu0 %v4080_v9 }
 0x519   : > { %2083 = vmatpush2.msra.mxu0 %v4083_v16 }
 0x51a   : > { %2084 = vmatprep.subr.mxu0 %v4090_v13 }
 0x51b   : > { %2085 = vmatpush2.msra.mxu0 %v4093_v36 }
 0x51c   : > { %2086 = vmatprep.subr.mxu0 %v4100_v32 }
 0x51d   : > { %2087 = vmatpush2.msra.mxu0 %v4103_v24 }
 0x51e   : > { %2088 = vmatprep.subr.mxu0 %v4110_v2 }
 0x51f   : > { %2089 = vmatpush2.msra.mxu0 %v4113_v61 }
 0x520   : > { %2090 = vmatprep.subr.mxu0 %v4124_v26 }
 0x521   : > { %2091 = vmatpush2.msra.mxu0 %v4127_v30 }
 0x522   : > { %2093 = vmatmul.mubr.f32.vlgmr.msra.gmra.mxu0 %v2020_v11 }
 0x523   : > { %2098 = vmatprep.mubr.f32.mxu0 %v2023_v21 }
 0x526   : > { %2099 = vmatmul.mubr.f32.gmra.mxu0 %v2022_v55 }
 0x527   : > { %2104 = vmatprep.mubr.f32.mxu0 %v2025_v56 }
 0x52a   : > { %2105 = vmatmul.mubr.f32.gmra.mxu0 %v2024_v51 }
 0x52b   : > { %2110 = vmatprep.mubr.f32.mxu0 %v2027_v17 }
 0x52e   : > { %2111 = vmatmul.mubr.f32.gmra.mxu0 %v2026_v41 }
 0x5a2   : > { %v1035_v50 = vpop.f32.mrf.mxu0 }
 0x5a3   : > { %v1036_v52 = vadd.f32 %v1035_v50, %v902_v33 }
 0x5a4   : > { %v1037_v45 = vpop.f32.mrf.mxu0 }
 0x5a5   : > { %v1038_v15 = vadd.f32 %v1037_v45, %v902_v33 }
 0x5a6   : > { %v1041_v14 = vpop.f32.mrf.mxu0 }
 0x5a7   : > { %v1042_v12 = vadd.f32 %v1041_v14, %v907_v10 }
 0x5a8   : > { %v1043_v40 = vpop.f32.mrf.mxu0 }
 0x5a9   : > { %v1044_v53 = vadd.f32 %v1043_v40, %v907_v10 }
 0x5aa   : > { %v1047_v8 = vpop.f32.mrf.mxu0 }
 0x5ab   : > { %v1048_v44 = vadd.f32 %v1047_v8, %v912_v58 }
 0x5ac   : > { %v1049_v54 = vpop.f32.mrf.mxu0 }
 0x5ad   : > { %v1050_v46 = vadd.f32 %v1049_v54, %v912_v58 }
 0x5ae   : > { %v1053_v37 = vpop.f32.mrf.mxu0 }
 0x5af   : > { %v1054_v35 = vadd.f32 %v1053_v37, %v917_v43 }
 0x5b0   : > { %v1055_v62 = vpop.f32.mrf.mxu0 }
 0x5b1   : > { %v1056_v57 = vadd.f32 %v1055_v62, %v917_v43 }
 0x5b3   : > { %2165 = vmatprep.subr.mxu0 %v1056_v57 }
 0x5b4   : > { %2166 = vmatpush1.xpose.msra.mxu0 %v1054_v35 }
 0x5b5   : > { %2167 = vmatprep.subr.mxu0 %v1050_v46 }
 0x5b8   : > { %2168 = vmatpush1.xpose.msra.mxu0 %v1048_v44 }
 0x5b9   : > { %2169 = vmatprep.subr.mxu0 %v1044_v53 }
 0x5bc   : > { %2170 = vmatpush1.xpose.msra.mxu0 %v1042_v12 }
 0x5bd   : > { %2171 = vmatprep.subr.mxu0 %v1038_v15 }
 0x5c0   : > { %2172 = vmatpush1.xpose.msra.mxu0 %v1036_v52 }
 0x5e2   : > { %v2094_v39 = vpop.f32.mrf.mxu0 }
 0x5e4   : > { %v2096_v7 = vpop.f32.mrf.mxu0 }
 0x5e5   : > { %2205 = vmatprep.mubr.f32.mxu0 %v2096_v7 }
 0x5e6   : > { %v2100_v48 = vpop.f32.mrf.mxu0  ;;  %2206 = vmatmul.mubr.f32.vlgmr.msra.gmra.mxu0 %v2094_v39 }
 0x5e8   : > { %v2102_v28 = vpop.f32.mrf.mxu0 }
 0x5e9   : > { %2210 = vmatprep.mubr.f32.mxu0 %v2102_v28 }
 0x5ea   : > { %v2106_v60 = vpop.f32.mrf.mxu0  ;;  %2211 = vmatmul.mubr.f32.gmra.mxu0 %v2100_v48 }
 0x5ec   : > { %v2108_v42 = vpop.f32.mrf.mxu0 }
 0x5ed   : > { %2215 = vmatprep.mubr.f32.mxu0 %v2108_v42 }
 0x5ee   : > { %v2112_v25 = vpop.f32.mrf.mxu0  ;;  %2216 = vmatmul.mubr.f32.gmra.mxu0 %v2106_v60 }
 0x5f0   : > { %v2114_v4 = vpop.f32.mrf.mxu0 }
 0x5f1   : > { %2220 = vmatprep.mubr.f32.mxu0 %v2114_v4 }
 0x5f2   : > { %2221 = vmatmul.mubr.f32.gmra.mxu0 %v2112_v25 }
 0x5f3   : > { %2878 = shalt.err (!%p2875_p0)
}
 0x5f4   : > { %s2879_s17 = scalar_lea.hbm %s4228_s25, 8192  ;;  %s2883_s11 = scalar_lea.hbm %s4464_s15, 16384 }
 0x5f5   : > { %p2880_p11 = scmp.ne.s32.totalorder %s4228_s25, %s2879_s17  ;;  %p2884_p5 = scmp.lt.s32.totalorder %s4228_s25, %s4464_s15 }
 0x5f6   : > { %p2885_p7 = scmp.lt.s32.totalorder %s2883_s11, %s2879_s17 }
 0x5f7   : > { %p2881_p12 = pnand %p2880_p11, %p4465_p6 }
 0x5f8   : > { %p2886_p2 = por %p2885_p7, %p2884_p5 }
 0x5f9   : > { %p2882_p4 = pneg %p2881_p12 }
 0x5fb   : > { %p2887_p13 = pnand %p2886_p2, %p2882_p4 }
 0x5fd   : > { %2890 = shalt.err (!%p2887_p13)
}
 0x5fe   : > { %s2971_s12 = smov 256   ;;  %s2972_s1 = smov 16   ;;  %v2129_v63 = vpop.permute.xlu0 %2128  ;;  %v2124_v3 = vpop.permute.xlu1 %2123 }
 0x5ff   : > { %2523 = dma.vmem_to_hbm [thread:$0]  (%p4465_p6), %s4230_s30, 8192, %s4228_s25, %s2239_s22, %s2971_s12, %s2971_s12, %s2972_s1  }
 0x600   : > { %p556_p8 = scmp.lt.s32.totalorder %s3067_s29, 1  ;;  %s4466_s20 = sld [smem:[#allocation40_spill]] }
 0x601   : > { %s2450_s21 = sshll.u32 %s3199_s0, 5  ;;  %s2516_s25 = sshll.u32 %s3067_s29, 9 }
 0x602   : > { %s557_s27 = scalar_select %p556_p8, %s3067_s29, 1  ;;  %v2134_v2 = vpop.permute.xlu0 %2133 }
 0x603   : > { %s555_s24 = scalar_lea.vmem [#allocation9], %s2450_s21  ;;  %s4467_s14 = sld [smem:[#allocation44_spill]] }
 0x604   : > { %s2514_s23 = sshll.u32 %s557_s27, 5  ;;  %s2273_s30 = sshll.u32 %s555_s24, 4  ;;  %s4264_s30 = int_to_ptr.vmem [resolvable:$true] %s2273_s30 }
 0x605   : > { %s2244_s12 = scalar_lea.sflag [#allocation10], %s3199_s0  ;;  %s2891_s1 = scalar_lea.vmem %s4264_s30, 512 }
 0x606   : > { %s560_s17 = scalar_lea.vmem %s4466_s20, %s2514_s23  ;;  %v2139_v30 = vpop.permute.xlu0 %2138  ;;  %p2892_p10 = scmp.ne.s32.totalorder %s4264_s30, %s2891_s1 }
 0x607   : > { %v2226_v9 = vld [vmem:[%s560_s17] sm:$0xff]  ;;  %v2227_v24 = vld [vmem:[%s560_s17 + $0x8] sm:$0xff]  ;;  %v2228_v27 = vld [vmem:[%s560_s17 + $0x10] sm:$0xff]  ;;  %s2973_s29 = smov [#allocation9]  }
 0x608   : > { %v2229_v20 = vld [vmem:[%s560_s17 + $0x18] sm:$0xff]  ;;  %p2893_p1 = pnand %p2892_p10, %p4465_p6  ;;  %s2895_s27 = sshll.u32 %s2973_s29, 4  ;;  %s2896_s27 = int_to_ptr.vmem [resolvable:$false] %s2895_s27 }
 0x609   : > { %s4270_s18 = scalar_lea.hbm %s4467_s14, %s2516_s25  ;;  %s2897_s23 = scalar_lea.vmem %s2896_s27, 1024 }
 0x60a   : > { %p2894_p3 = pneg %p2893_p1  ;;  %p2898_p9 = scmp.lt.s32.totalorder %s4264_s30, %s2896_s27 }
 0x60b   : > { %p2899_p0 = scmp.lt.s32.totalorder %s2897_s23, %s2891_s1 }
 0x60d   : > { %p2900_p11 = por %p2899_p0, %p2898_p9 }
 0x60f   : > { %p2901_p12 = pnand %p2900_p11, %p2894_p3 }
 0x6a6   : > { %v2207_v34 = vpop.f32.mrf.mxu0 }
 0x6a7   : > { %v2208_v16 = vadd.f32 %v2207_v34, %v2124_v3 }
 0x6a8   : > { %v2209_v13 = vpop.f32.mrf.mxu0 }
 0x6a9   : > { %v2230_v36 = vadd.f32 %v2226_v9, %v2208_v16 }
 0x6aa   : > { %v2212_v32 = vpop.f32.mrf.mxu0 }
 0x6ab   : > { %2234 = vst.msk [vmem:[%s555_s24] sm:$0xff] %vm1122_vm2, %v2230_v36  ;;  %v2213_v22 = vadd.f32 %v2212_v32, %v2129_v63 }
 0x6ac   : > { %v2214_v61 = vpop.f32.mrf.mxu0 }
 0x6ad   : > { %v2231_v1 = vadd.f32 %v2227_v24, %v2213_v22 }
 0x6ae   : > { %v2217_v5 = vpop.f32.mrf.mxu0 }
 0x6af   : > { %2235 = vst.msk [vmem:[%s555_s24 + $0x8] sm:$0xff] %vm1122_vm2, %v2231_v1  ;;  %v2218_v23 = vadd.f32 %v2217_v5, %v2134_v2 }
 0x6b0   : > { %v2219_v26 = vpop.f32.mrf.mxu0 }
 0x6b1   : > { %v2232_v29 = vadd.f32 %v2228_v27, %v2218_v23 }
 0x6b2   : > { %v2222_v47 = vpop.f32.mrf.mxu0 }
 0x6b3   : > { %2236 = vst.msk [vmem:[%s555_s24 + $0x10] sm:$0xff] %vm1122_vm2, %v2232_v29  ;;  %v2223_v19 = vadd.f32 %v2222_v47, %v2139_v30 }
 0x6b4   : > { %v2224_v59 = vpop.f32.mrf.mxu0 }
 0x6b5   : > { %v2233_v49 = vadd.f32 %v2229_v20, %v2223_v19 }
 0x6b7   : > { %2237 = vst.msk [vmem:[%s555_s24 + $0x18] sm:$0xff] %vm1122_vm2, %v2233_v49 }
 0x6b8   : > { %2904 = shalt.err (!%p2901_p12)
}
 0x6b9   : > { %s2905_s10 = scalar_lea.hbm %s4270_s18, 512  ;;  %s2909_s17 = scalar_lea.hbm %s4467_s14, 1024 }
 0x6ba   : > { %p2906_p4 = scmp.ne.s32.totalorder %s4270_s18, %s2905_s10  ;;  %p2910_p2 = scmp.lt.s32.totalorder %s4270_s18, %s4467_s14 }
 0x6bb   : > { %p2911_p13 = scmp.lt.s32.totalorder %s2909_s17, %s2905_s10 }
 0x6bc   : > { %p2907_p5 = pnand %p2906_p4, %p4465_p6 }
 0x6bd   : > { %p2912_p8 = por %p2911_p13, %p2910_p2 }
 0x6be   : > { %p2908_p7 = pneg %p2907_p5 }
 0x6c0   : > { %p2913_p10 = pnand %p2912_p8, %p2908_p7 }
 0x6c2   : > { %2916 = shalt.err (!%p2913_p10)
}
 0x6c3   : > { %s2974_s25 = smov 128   ;;  %s2975_s22 = smov 8  }
 0x6c4   : > { %2524 = dma.vmem_to_hbm [thread:$0]  (%p4465_p6), %s4264_s30, 512, %s4270_s18, %s2244_s12, %s2974_s25, %s2974_s25, %s2975_s22  }
 0x6c5 PF: > { %s4468_s11 = sld [smem:[#allocation15_spill]]  ;;  %p4471_p3 = scmp.ge.s32.totalorder %s2963_s28, 2 }
 0x6c6   : > { %s4469_s1 = sld [smem:[#allocation20_spill]] }
 0x6cb   : > { %s2288_s29 = sand.u32 1, %s4468_s11  }
 0x6cc   : > { %p4470_p1 = scmp.ne.s32.totalorder %s4469_s1, 0  ;;  %s2289_s27 = scalar_lea.sflag [#allocation4], %s2288_s29 }
 0x6ce   : > { %p2538_p9 = pnand %p4471_p3, %p4470_p1 }
 0x6d0   : > { %p2539_p0 = pneg %p2538_p9 }
 0x6d2   : > { %2942 = dma.done.wait (%p2539_p0), %s2289_s27, 8192  }
 0x6d3   : > { %2944 = vsyncadd (%p2539_p0), %s2289_s27, 4294959104  ;;  %s2298_s23 = scalar_lea.sflag [#allocation10], %s2288_s29 }
 0x6d4   : > { %2946 = dma.done.wait (%p2539_p0), %s2298_s23, 512  }
 0x6d5   : > { %2948 = vsyncadd (%p2539_p0), %s2298_s23, 4294966784  ;;  %s4472_s28 = sld [smem:[#allocation17_spill]]  ;;  %s4475_s25 = smov %s2955_s26 }
 0x6d6   : > { %s4473_s13 = sld [smem:[#allocation16_spill]] }
 0x6d7   : > { %s4474_s27 = sld [smem:[#allocation18_spill]] }
 0x6db   : > { %p33_p6 = scmp.ge.s32.totalorder %s4472_s28, 4  }
 0x6dc   : > { %s4476_s26 = smov %s4473_s13 }
 0x6dd   :  { %35 = sbr.rel (!%p33_p6) target bundleno = 17 (0x11), region = 157 }
 0x6e2   :  { %2303 = vsyncpa [#allocation3], 1 }
 0x6e3   :  { %2305 = vsyncpa [#allocation3 + $0x1], 1 }
 0x6e4   :  { %2306 = vsyncpa [#allocation6], 1 }
 0x6e5   :  { %2308 = vsyncpa [#allocation6 + $0x1], 1 }
 0x6e6   :  { %2309 = vsyncpa [#allocation4], 1 }
 0x6e7   :  { %2311 = vsyncpa [#allocation4 + $0x1], 1 }
 0x6e8   :  { %2312 = vsyncpa [#allocation10], 1 }
 0x6e9   :  { %2314 = vsyncpa [#allocation10 + $0x1], 1 }

</bundles_post_ra>
